<compile_context>
chip_gen: v7x
topology: tpu7x:2x2x1
jax: 0.10.0
libtpu: 0.0.40
codegen_flags: <defaults>
</compile_context>

<pallas_src>
import math

import jax
import jax.numpy as jnp
from jax.experimental import pallas as pl
from jax.experimental.pallas import tpu as pltpu

MIX_DEPTH = 4          # EarthLoc uses mix_depth=4, mlp_ratio=1
LN_EPS = 1e-5          # torch.nn.LayerNorm default eps
NORM_EPS = 1e-12       # torch.nn.functional.normalize default eps


# ---------------------------------------------------------------------------
# Kernel 1: MixVPR aggregator in transposed layout (HW on sublanes, C on lanes)
#   FeatureMixerLayer x4 (LN affine pre-folded) + channel_proj + row_proj +
#   first L2-normalize.  One grid step == one batch element.  All matmuls NN.
# ---------------------------------------------------------------------------
def _mixvpr_kernel(x_ref,          # (1, HW, C)  feature map slab (HW rows, C lanes)
                   bias_ref,       # (HW, 2*MIX_DEPTH) f32: [b1' | b2] columns
                   w1_ref,         # (MIX_DEPTH, HW, HW) bf16, gamma folded into columns
                   w2_ref,         # (MIX_DEPTH, HW, HW) bf16 (raw torch layout)
                   rp_w_ref,       # (OR, HW) bf16 (raw torch layout)
                   cp_wt_ref,      # (C, OC)  bf16 (= cp_w.T)
                   proj_b_ref,     # (OR, OC) f32 fused projection bias
                   out_ref):       # (1, OR, OC) f32, L2-normalized descriptor (lane-dense)
    x = x_ref[0].astype(jnp.float32)                     # (HW, C)
    hw = x.shape[0]
    inv_hw = 1.0 / hw
    biases = bias_ref[...]                               # (HW, 2*MIX_DEPTH)

    # --- FeatureMixerLayer x MIX_DEPTH: x = x + Lin2(ReLU(Lin1(LN(x)))) ---
    # In transposed layout the LN / Linear act along the sublane (HW) axis, so
    # the linears are W @ x (clean MXU NN matmuls).  The LN affine (gamma,
    # beta) has been folded into w1 / b1' in the wrapper (exact math).
    for layer in range(MIX_DEPTH):
        # Two-pass LayerNorm statistics over the HW axis (numerically stable).
        mu = jnp.sum(x, axis=0, keepdims=True) * inv_hw      # (1, C)
        xc = x - mu
        var = jnp.sum(xc * xc, axis=0, keepdims=True) * inv_hw
        xn = xc * jax.lax.rsqrt(var + LN_EPS)                # (HW, C)

        b1_col = biases[:, layer:layer + 1]                              # (HW, 1)
        b2_col = biases[:, MIX_DEPTH + layer:MIX_DEPTH + layer + 1]      # (HW, 1)

        h = jnp.dot(w1_ref[layer], xn.astype(jnp.bfloat16),
                    preferred_element_type=jnp.float32) + b1_col         # (HW, C)
        h = jnp.maximum(h, 0.0)
        h = jnp.dot(w2_ref[layer], h.astype(jnp.bfloat16),
                    preferred_element_type=jnp.float32) + b2_col         # (HW, C)
        x = x + h

    # --- projections, reassociated small-side-first (no transposes) ---
    #   u   = rp_w @ x_t              : (OR, HW) @ (HW, C) -> (OR, C)
    #   z^T = u @ cp_w^T + fused bias : (OR, C) @ (C, OC)  -> (OR, OC)
    u = jnp.dot(rp_w_ref[...], x.astype(jnp.bfloat16),
                preferred_element_type=jnp.float32)                      # (OR, C)
    z = jnp.dot(u.astype(jnp.bfloat16), cp_wt_ref[...],
                preferred_element_type=jnp.float32) + proj_b_ref[...]    # (OR, OC)

    # --- first F.normalize: over the whole per-batch descriptor ---
    ss = jnp.sum(z * z, keepdims=True)                                   # (1, 1)
    inv = jax.lax.rsqrt(jnp.maximum(ss, NORM_EPS * NORM_EPS))
    out_ref[...] = (z * inv)[None].astype(out_ref.dtype)


# ---------------------------------------------------------------------------
# Kernel 2: fc as a K-tiled, N-split weight-streaming matmul.
#   grid = (n_split, nk); output block (B, D/n_split) is resident across the
#   K axis (accumulate directly into it, no scratch).  The "parallel" N axis
#   lets the two v7x TensorCores stream disjoint weight halves concurrently.
# ---------------------------------------------------------------------------
def _fc_kernel(d_ref,          # (B, tk)  block of the (normalized) descriptor
               fc_wt_ref,      # (tk, tn) bf16 block of the permuted fc weight
               fc_b_ref,       # (1, tn)  f32 bias block
               out_ref):       # (B, tn)  f32, resident across the K grid axis
    k = pl.program_id(1)

    @pl.when(k == 0)
    def _():
        out_ref[...] = jnp.broadcast_to(fc_b_ref[...], out_ref.shape)

    out_ref[...] += jnp.dot(d_ref[...].astype(jnp.bfloat16), fc_wt_ref[...],
                            preferred_element_type=jnp.float32)


# ---------------------------------------------------------------------------
# Kernel 3: tiny final L2-normalize over the full descriptor rows.
# ---------------------------------------------------------------------------
def _l2norm_kernel(x_ref, out_ref):
    x = x_ref[...]
    inv = jax.lax.rsqrt(jnp.maximum(
        jnp.sum(x * x, axis=-1, keepdims=True), NORM_EPS * NORM_EPS))
    out_ref[...] = (x * inv).astype(out_ref.dtype)


# ---------------------------------------------------------------------------
# One-time weight preprocessing.  Call ONCE at model init (not per forward):
# at production D=4096 the fc permute/cast alone is ~96 MB of HBM traffic.
# ---------------------------------------------------------------------------
def prepare_earthloc_params(params):
    ln_g, ln_b = params['ln_g'], params['ln_b']           # (MD, hw)
    w1, b1 = params['w1'], params['b1']                    # (MD, hw, hw), (MD, hw)
    w2, b2 = params['w2'], params['b2']
    cp_w, cp_b = params['cp_w'], params['cp_b']            # (OC, C), (1, OC)
    rp_w, rp_b = params['rp_w'], params['rp_b']            # (OR, hw), (1, OR)
    fc_w, fc_b = params['fc_w'], params['fc_b']            # (D, D), (1, D)

    oc = cp_w.shape[0]
    out_rows = rp_w.shape[0]
    desc_dim = fc_w.shape[0]

    # Fold LayerNorm affine into the first mixer linear (exact):
    #   W1 @ (g*xn + beta) + b1  ==  (W1 * g_cols) @ xn + (b1 + W1 @ beta)
    w1_folded = (w1 * ln_g[:, None, :]).astype(jnp.bfloat16)            # (MD, hw, hw)
    b1_folded = b1 + jnp.einsum('loi,li->lo', w1, ln_b)                  # (MD, hw)
    mix_bias = jnp.concatenate([b1_folded.T, b2.T], axis=1)             # (hw, 2*MD) f32

    # Fused projection bias: z^T[r, oc] += cp_b[oc] * sum_hw(rp_w[r]) + rp_b[r].
    s = jnp.sum(rp_w, axis=1)                                            # (OR,)
    proj_b = s[:, None] * cp_b + rp_b[0][:, None]                        # (OR, OC) f32

    # fc weight: transpose for x @ W^T and permute its input rows from the
    # PyTorch (OC, OR)-major flatten to the kernel's (OR, OC)-major flatten
    # (exact equivalence; the intervening L2-norm is permutation-invariant).
    fc_wt = fc_w.T.reshape(oc, out_rows, desc_dim)
    fc_wt = jnp.swapaxes(fc_wt, 0, 1).reshape(desc_dim, desc_dim)
    fc_wt = fc_wt.astype(jnp.bfloat16)

    return dict(
        mix_bias=mix_bias,
        w1=w1_folded,
        w2=w2.astype(jnp.bfloat16),
        rp_w=rp_w.astype(jnp.bfloat16),
        cp_wt=cp_w.T.astype(jnp.bfloat16),
        proj_b=proj_b,
        fc_wt=fc_wt,
        fc_b=fc_b,
    )


# ---------------------------------------------------------------------------
# Wrapper.  `feat_nhwc` is the backbone feature map in NHWC (native TPU conv
# layout) so the (b, hw, c) slab the kernel consumes is a free reshape.
# ---------------------------------------------------------------------------
def earthloc_head(feat_nhwc, prep, *, max_fc_tk=1024):
    """feat_nhwc: (b, h, w, c) -> L2-normalized descriptor (b, desc_dim).

    `prep` = prepare_earthloc_params(raw_params), computed once at init.
    max_fc_tk: fc contraction tile (1024 is v7x-safe; v5e/v6e may use 2048).
    """
    b, h, w, c = feat_nhwc.shape
    hw = h * w
    out_rows = prep['rp_w'].shape[0]
    oc = prep['cp_wt'].shape[1]
    desc_dim = prep['fc_wt'].shape[0]

    x_t = feat_nhwc.reshape(b, hw, c)                    # free reshape (NHWC)

    def invariant_spec(shape):
        ndim = len(shape)
        # Grid-invariant operand: single-buffer it (index_map always block 0).
        return pl.BlockSpec(shape, lambda i, _n=ndim: (0,) * _n,
                            pipeline_mode=pl.Buffered(1))

    zt = pl.pallas_call(
        _mixvpr_kernel,
        out_shape=jax.ShapeDtypeStruct((b, out_rows, oc), jnp.float32),
        grid=(b,),
        in_specs=[
            pl.BlockSpec((1, hw, c), lambda i: (i, 0, 0)),
            invariant_spec(prep['mix_bias'].shape),
            invariant_spec(prep['w1'].shape),
            invariant_spec(prep['w2'].shape),
            invariant_spec(prep['rp_w'].shape),
            invariant_spec(prep['cp_wt'].shape),
            invariant_spec(prep['proj_b'].shape),
        ],
        out_specs=pl.BlockSpec((1, out_rows, oc), lambda i: (i, 0, 0)),
        compiler_params=pltpu.CompilerParams(
            dimension_semantics=("parallel",),           # batch elems independent
            vmem_limit_bytes=32 * 1024 * 1024),
    )(x_t, prep['mix_bias'], prep['w1'], prep['w2'],
      prep['rp_w'], prep['cp_wt'], prep['proj_b'])

    d = zt.reshape(b, desc_dim)                          # (OR, OC)-major flatten (free)

    # --- fc tiling: contraction tile tk (weight streams through VMEM) and a
    #     2-way output-column split for v7x megacore. ---
    if desc_dim % 128 == 0:
        tk = 128
        while tk * 2 <= max_fc_tk and desc_dim % (tk * 2) == 0:
            tk *= 2
    else:
        tk = desc_dim
    nk = desc_dim // tk
    n_split = 2 if desc_dim % 256 == 0 else 1
    tn = desc_dim // n_split

    fc_out = pl.pallas_call(
        _fc_kernel,
        out_shape=jax.ShapeDtypeStruct((b, desc_dim), jnp.float32),
        grid=(n_split, nk),
        in_specs=[
            pl.BlockSpec((b, tk), lambda n, k: (0, k)),
            pl.BlockSpec((tk, tn), lambda n, k: (k, n)),
            pl.BlockSpec((1, tn), lambda n, k: (0, n)),
        ],
        out_specs=pl.BlockSpec((b, tn), lambda n, k: (0, n)),
        compiler_params=pltpu.CompilerParams(
            dimension_semantics=("parallel", "arbitrary"),
            vmem_limit_bytes=32 * 1024 * 1024),
    )(d, prep['fc_wt'], prep['fc_b'])

    # Final L2-normalize over the full row (crosses the N split -> own kernel).
    out = pl.pallas_call(
        _l2norm_kernel,
        out_shape=jax.ShapeDtypeStruct((b, desc_dim), jnp.float32),
    )(fc_out)
    return out


# ---------------------------------------------------------------------------
# Pure-JAX reference of the head (mirrors the PyTorch module, f32, NCHW)
# ---------------------------------------------------------------------------
def earthloc_head_ref(feat_nchw, params):
    b, c, h, w = feat_nchw.shape
    hw = h * w
    x = feat_nchw.reshape(b, c, hw)
    for l in range(MIX_DEPTH):
        mu = x.mean(-1, keepdims=True)
        var = ((x - mu) ** 2).mean(-1, keepdims=True)
        xn = (x - mu) / jnp.sqrt(var + LN_EPS)
        xn = xn * params['ln_g'][l] + params['ln_b'][l]
        hid = jnp.maximum(xn @ params['w1'][l].T + params['b1'][l], 0.0)
        x = x + (hid @ params['w2'][l].T + params['b2'][l])
    y = jnp.swapaxes(x, 1, 2) @ params['cp_w'].T + params['cp_b']     # (b, hw, oc)
    z = jnp.swapaxes(y, 1, 2) @ params['rp_w'].T + params['rp_b']     # (b, oc, or)
    d = z.reshape(b, -1)
    d = d / jnp.maximum(jnp.linalg.norm(d, axis=-1, keepdims=True), NORM_EPS)
    o = d @ params['fc_w'].T + params['fc_b']
    return o / jnp.maximum(jnp.linalg.norm(o, axis=-1, keepdims=True), NORM_EPS)


# ---------------------------------------------------------------------------
# Deterministic parameter init (matches shapes implied by the module __init__)
# ---------------------------------------------------------------------------
def init_params(key, c, hw, out_channels, out_rows, desc_dim):
    keys = jax.random.split(key, 5)

    # FeatureMixerLayer params: trunc_normal(std=0.02) weights, zero biases,
    # LayerNorm gamma=1 / beta=0.
    ln_g = jnp.ones((MIX_DEPTH, hw), jnp.float32)
    ln_b = jnp.zeros((MIX_DEPTH, hw), jnp.float32)
    w1 = 0.02 * jax.random.truncated_normal(keys[0], -2.0, 2.0,
                                            (MIX_DEPTH, hw, hw), jnp.float32)
    b1 = jnp.zeros((MIX_DEPTH, hw), jnp.float32)
    w2 = 0.02 * jax.random.truncated_normal(keys[1], -2.0, 2.0,
                                            (MIX_DEPTH, hw, hw), jnp.float32)
    b2 = jnp.zeros((MIX_DEPTH, hw), jnp.float32)

    def linear(k, out_f, in_f):
        bound = 1.0 / math.sqrt(in_f)
        kw, kb = jax.random.split(k)
        wgt = jax.random.uniform(kw, (out_f, in_f), jnp.float32, -bound, bound)
        bia = jax.random.uniform(kb, (1, out_f), jnp.float32, -bound, bound)
        return wgt, bia

    cp_w, cp_b = linear(keys[2], out_channels, c)      # channel_proj
    rp_w, rp_b = linear(keys[3], out_rows, hw)         # row_proj
    fc_w, fc_b = linear(keys[4], desc_dim, desc_dim)   # final fc

    return dict(ln_g=ln_g, ln_b=ln_b, w1=w1, b1=b1, w2=w2, b2=b2,
                cp_w=cp_w, cp_b=cp_b, rp_w=rp_w, rp_b=rp_b,
                fc_w=fc_w, fc_b=fc_b)


if __name__ == "__main__":
    key = jax.random.PRNGKey(0)
    # Small shapes consistent with the module (scaled down from c=1024,
    # h=w=ceil(320/16)=20, out_channels=desc_dim//4=1024, out_rows=4).
    B, C, H, W = 2, 64, 8, 8
    OUT_CHANNELS, OUT_ROWS = 256, 4
    DESC_DIM = OUT_CHANNELS * OUT_ROWS        # 1024

    k_feat, k_params = jax.random.split(key)
    # Backbone feature-map stand-in, produced directly in NHWC (TPU conv layout).
    feat_nhwc = jax.random.normal(k_feat, (B, H, W, C), jnp.float32)
    params = init_params(k_params, C, H * W, OUT_CHANNELS, OUT_ROWS, DESC_DIM)
    prep = prepare_earthloc_params(params)    # one-time weight preprocessing

    # max_fc_tk=256 at these small shapes so the fc K-tiling/accumulation and
    # the N-split are actually exercised (production default is 1024).
    out = earthloc_head(feat_nhwc, prep, max_fc_tk=256)
    out = jax.block_until_ready(out)
    assert out.shape == (B, DESC_DIM), out.shape
    assert bool(jnp.all(jnp.isfinite(out)))
    # rows are L2-normalized
    assert bool(jnp.allclose(jnp.linalg.norm(out, axis=-1), 1.0, atol=1e-4))
    # matches the f32 reference (bf16 matmul tolerance)
    feat_nchw = jnp.transpose(feat_nhwc, (0, 3, 1, 2))
    ref = earthloc_head_ref(feat_nchw, params)
    max_err = float(jnp.max(jnp.abs(out - ref)))
    assert max_err < 2e-2, max_err
    print("KERNEL_OK")
</pallas_src>

<mosaic_0001>
module attributes {stable_mosaic.version = 11 : i64} {
  func.func @_mixvpr_kernel(%arg0: i32, %arg1: memref<1x64x64xf32, #tpu.memory_space<vmem>>, %arg2: memref<64x8xf32, #tpu.memory_space<vmem>>, %arg3: memref<4x64x64xbf16, #tpu.memory_space<vmem>>, %arg4: memref<4x64x64xbf16, #tpu.memory_space<vmem>>, %arg5: memref<4x64xbf16, #tpu.memory_space<vmem>>, %arg6: memref<64x256xbf16, #tpu.memory_space<vmem>>, %arg7: memref<4x256xf32, #tpu.memory_space<vmem>>, %arg8: memref<1x4x256xf32, #tpu.memory_space<vmem>>) attributes {dimension_semantics = [#tpu.dimension_semantics<parallel>], iteration_bounds = array<i64: 2>, scalar_prefetch = 0 : i64, scratch_operands = 0 : i64, tpu.core_type = #tpu.core_type<tc>, window_params = [{transform_indices = @transform_0, window_bounds = array<i64: 1, 64, 64>}, {pipeline_mode = #tpu.pipeline_mode<synchronous>, transform_indices = @transform_1, window_bounds = array<i64: 64, 8>}, {pipeline_mode = #tpu.pipeline_mode<synchronous>, transform_indices = @transform_2, window_bounds = array<i64: 4, 64, 64>}, {pipeline_mode = #tpu.pipeline_mode<synchronous>, transform_indices = @transform_3, window_bounds = array<i64: 4, 64, 64>}, {pipeline_mode = #tpu.pipeline_mode<synchronous>, transform_indices = @transform_4, window_bounds = array<i64: 4, 64>}, {pipeline_mode = #tpu.pipeline_mode<synchronous>, transform_indices = @transform_5, window_bounds = array<i64: 64, 256>}, {pipeline_mode = #tpu.pipeline_mode<synchronous>, transform_indices = @transform_6, window_bounds = array<i64: 4, 256>}, {transform_indices = @transform_7, window_bounds = array<i64: 1, 4, 256>}]} {
    %c0 = arith.constant 0 : index
    %c0_0 = arith.constant 0 : index
    %c0_1 = arith.constant 0 : index
    %0 = vector.load %arg1[%c0, %c0_0, %c0_1] : memref<1x64x64xf32, #tpu.memory_space<vmem>>, vector<1x64x64xf32>
    %1 = vector.shape_cast %0 : vector<1x64x64xf32> to vector<64x64xf32>
    %c0_2 = arith.constant 0 : index
    %c0_3 = arith.constant 0 : index
    %2 = vector.load %arg2[%c0_2, %c0_3] : memref<64x8xf32, #tpu.memory_space<vmem>>, vector<64x8xf32>
    %cst = arith.constant dense<0.000000e+00> : vector<64xf32>
    %3 = vector.multi_reduction <add>, %1, %cst [0] : vector<64x64xf32> to vector<64xf32>
    %4 = vector.shape_cast %3 : vector<64xf32> to vector<1x64xf32>
    %cst_4 = arith.constant 1.562500e-02 : f32
    %5 = vector.broadcast %cst_4 : f32 to vector<1x64xf32>
    %6 = arith.mulf %4, %5 : vector<1x64xf32>
    %7 = vector.broadcast %6 : vector<1x64xf32> to vector<64x64xf32>
    %8 = arith.subf %1, %7 : vector<64x64xf32>
    %9 = arith.mulf %8, %8 : vector<64x64xf32>
    %cst_5 = arith.constant dense<0.000000e+00> : vector<64xf32>
    %10 = vector.multi_reduction <add>, %9, %cst_5 [0] : vector<64x64xf32> to vector<64xf32>
    %11 = vector.shape_cast %10 : vector<64xf32> to vector<1x64xf32>
    %cst_6 = arith.constant 1.562500e-02 : f32
    %12 = vector.broadcast %cst_6 : f32 to vector<1x64xf32>
    %13 = arith.mulf %11, %12 : vector<1x64xf32>
    %cst_7 = arith.constant 9.99999974E-6 : f32
    %14 = vector.broadcast %cst_7 : f32 to vector<1x64xf32>
    %15 = arith.addf %13, %14 : vector<1x64xf32>
    %16 = math.rsqrt %15 : vector<1x64xf32>
    %17 = vector.broadcast %16 : vector<1x64xf32> to vector<64x64xf32>
    %18 = arith.mulf %8, %17 : vector<64x64xf32>
    %19 = vector.extract_strided_slice %2 {offsets = [0, 0], sizes = [64, 1], strides = [1, 1]} : vector<64x8xf32> to vector<64x1xf32>
    %20 = vector.extract_strided_slice %2 {offsets = [0, 4], sizes = [64, 1], strides = [1, 1]} : vector<64x8xf32> to vector<64x1xf32>
    %c0_8 = arith.constant 0 : index
    %c0_9 = arith.constant 0 : index
    %c0_10 = arith.constant 0 : index
    %21 = vector.load %arg3[%c0_8, %c0_9, %c0_10] : memref<4x64x64xbf16, #tpu.memory_space<vmem>>, vector<1x64x64xbf16>
    %22 = vector.shape_cast %21 : vector<1x64x64xbf16> to vector<64x64xbf16>
    %23 = arith.truncf %18 : vector<64x64xf32> to vector<64x64xbf16>
    %cst_11 = arith.constant dense<0.000000e+00> : vector<64x64xf32>
    %24 = tpu.matmul %22, %23, %cst_11 {dimension_numbers = #tpu.dot_dimension_numbers<[1], [0], [0], [1], [0, 0, 1, 1], [], []>} : vector<64x64xbf16>, vector<64x64xbf16>, vector<64x64xf32> -> vector<64x64xf32>
    %25 = vector.broadcast %19 : vector<64x1xf32> to vector<64x64xf32>
    %26 = arith.addf %24, %25 : vector<64x64xf32>
    %cst_12 = arith.constant 0.000000e+00 : f32
    %27 = vector.broadcast %cst_12 : f32 to vector<64x64xf32>
    %28 = arith.maximumf %26, %27 : vector<64x64xf32>
    %c0_13 = arith.constant 0 : index
    %c0_14 = arith.constant 0 : index
    %c0_15 = arith.constant 0 : index
    %29 = vector.load %arg4[%c0_13, %c0_14, %c0_15] : memref<4x64x64xbf16, #tpu.memory_space<vmem>>, vector<1x64x64xbf16>
    %30 = vector.shape_cast %29 : vector<1x64x64xbf16> to vector<64x64xbf16>
    %31 = arith.truncf %28 : vector<64x64xf32> to vector<64x64xbf16>
    %cst_16 = arith.constant dense<0.000000e+00> : vector<64x64xf32>
    %32 = tpu.matmul %30, %31, %cst_16 {dimension_numbers = #tpu.dot_dimension_numbers<[1], [0], [0], [1], [0, 0, 1, 1], [], []>} : vector<64x64xbf16>, vector<64x64xbf16>, vector<64x64xf32> -> vector<64x64xf32>
    %33 = vector.broadcast %20 : vector<64x1xf32> to vector<64x64xf32>
    %34 = arith.addf %32, %33 : vector<64x64xf32>
    %35 = arith.addf %1, %34 : vector<64x64xf32>
    %cst_17 = arith.constant dense<0.000000e+00> : vector<64xf32>
    %36 = vector.multi_reduction <add>, %35, %cst_17 [0] : vector<64x64xf32> to vector<64xf32>
    %37 = vector.shape_cast %36 : vector<64xf32> to vector<1x64xf32>
    %cst_18 = arith.constant 1.562500e-02 : f32
    %38 = vector.broadcast %cst_18 : f32 to vector<1x64xf32>
    %39 = arith.mulf %37, %38 : vector<1x64xf32>
    %40 = vector.broadcast %39 : vector<1x64xf32> to vector<64x64xf32>
    %41 = arith.subf %35, %40 : vector<64x64xf32>
    %42 = arith.mulf %41, %41 : vector<64x64xf32>
    %cst_19 = arith.constant dense<0.000000e+00> : vector<64xf32>
    %43 = vector.multi_reduction <add>, %42, %cst_19 [0] : vector<64x64xf32> to vector<64xf32>
    %44 = vector.shape_cast %43 : vector<64xf32> to vector<1x64xf32>
    %cst_20 = arith.constant 1.562500e-02 : f32
    %45 = vector.broadcast %cst_20 : f32 to vector<1x64xf32>
    %46 = arith.mulf %44, %45 : vector<1x64xf32>
    %cst_21 = arith.constant 9.99999974E-6 : f32
    %47 = vector.broadcast %cst_21 : f32 to vector<1x64xf32>
    %48 = arith.addf %46, %47 : vector<1x64xf32>
    %49 = math.rsqrt %48 : vector<1x64xf32>
    %50 = vector.broadcast %49 : vector<1x64xf32> to vector<64x64xf32>
    %51 = arith.mulf %41, %50 : vector<64x64xf32>
    %52 = vector.extract_strided_slice %2 {offsets = [0, 1], sizes = [64, 1], strides = [1, 1]} : vector<64x8xf32> to vector<64x1xf32>
    %53 = vector.extract_strided_slice %2 {offsets = [0, 5], sizes = [64, 1], strides = [1, 1]} : vector<64x8xf32> to vector<64x1xf32>
    %c1 = arith.constant 1 : index
    %c0_22 = arith.constant 0 : index
    %c0_23 = arith.constant 0 : index
    %54 = vector.load %arg3[%c1, %c0_22, %c0_23] : memref<4x64x64xbf16, #tpu.memory_space<vmem>>, vector<1x64x64xbf16>
    %55 = vector.shape_cast %54 : vector<1x64x64xbf16> to vector<64x64xbf16>
    %56 = arith.truncf %51 : vector<64x64xf32> to vector<64x64xbf16>
    %cst_24 = arith.constant dense<0.000000e+00> : vector<64x64xf32>
    %57 = tpu.matmul %55, %56, %cst_24 {dimension_numbers = #tpu.dot_dimension_numbers<[1], [0], [0], [1], [0, 0, 1, 1], [], []>} : vector<64x64xbf16>, vector<64x64xbf16>, vector<64x64xf32> -> vector<64x64xf32>
    %58 = vector.broadcast %52 : vector<64x1xf32> to vector<64x64xf32>
    %59 = arith.addf %57, %58 : vector<64x64xf32>
    %cst_25 = arith.constant 0.000000e+00 : f32
    %60 = vector.broadcast %cst_25 : f32 to vector<64x64xf32>
    %61 = arith.maximumf %59, %60 : vector<64x64xf32>
    %c1_26 = arith.constant 1 : index
    %c0_27 = arith.constant 0 : index
    %c0_28 = arith.constant 0 : index
    %62 = vector.load %arg4[%c1_26, %c0_27, %c0_28] : memref<4x64x64xbf16, #tpu.memory_space<vmem>>, vector<1x64x64xbf16>
    %63 = vector.shape_cast %62 : vector<1x64x64xbf16> to vector<64x64xbf16>
    %64 = arith.truncf %61 : vector<64x64xf32> to vector<64x64xbf16>
    %cst_29 = arith.constant dense<0.000000e+00> : vector<64x64xf32>
    %65 = tpu.matmul %63, %64, %cst_29 {dimension_numbers = #tpu.dot_dimension_numbers<[1], [0], [0], [1], [0, 0, 1, 1], [], []>} : vector<64x64xbf16>, vector<64x64xbf16>, vector<64x64xf32> -> vector<64x64xf32>
    %66 = vector.broadcast %53 : vector<64x1xf32> to vector<64x64xf32>
    %67 = arith.addf %65, %66 : vector<64x64xf32>
    %68 = arith.addf %35, %67 : vector<64x64xf32>
    %cst_30 = arith.constant dense<0.000000e+00> : vector<64xf32>
    %69 = vector.multi_reduction <add>, %68, %cst_30 [0] : vector<64x64xf32> to vector<64xf32>
    %70 = vector.shape_cast %69 : vector<64xf32> to vector<1x64xf32>
    %cst_31 = arith.constant 1.562500e-02 : f32
    %71 = vector.broadcast %cst_31 : f32 to vector<1x64xf32>
    %72 = arith.mulf %70, %71 : vector<1x64xf32>
    %73 = vector.broadcast %72 : vector<1x64xf32> to vector<64x64xf32>
    %74 = arith.subf %68, %73 : vector<64x64xf32>
    %75 = arith.mulf %74, %74 : vector<64x64xf32>
    %cst_32 = arith.constant dense<0.000000e+00> : vector<64xf32>
    %76 = vector.multi_reduction <add>, %75, %cst_32 [0] : vector<64x64xf32> to vector<64xf32>
    %77 = vector.shape_cast %76 : vector<64xf32> to vector<1x64xf32>
    %cst_33 = arith.constant 1.562500e-02 : f32
    %78 = vector.broadcast %cst_33 : f32 to vector<1x64xf32>
    %79 = arith.mulf %77, %78 : vector<1x64xf32>
    %cst_34 = arith.constant 9.99999974E-6 : f32
    %80 = vector.broadcast %cst_34 : f32 to vector<1x64xf32>
    %81 = arith.addf %79, %80 : vector<1x64xf32>
    %82 = math.rsqrt %81 : vector<1x64xf32>
    %83 = vector.broadcast %82 : vector<1x64xf32> to vector<64x64xf32>
    %84 = arith.mulf %74, %83 : vector<64x64xf32>
    %85 = vector.extract_strided_slice %2 {offsets = [0, 2], sizes = [64, 1], strides = [1, 1]} : vector<64x8xf32> to vector<64x1xf32>
    %86 = vector.extract_strided_slice %2 {offsets = [0, 6], sizes = [64, 1], strides = [1, 1]} : vector<64x8xf32> to vector<64x1xf32>
    %c2 = arith.constant 2 : index
    %c0_35 = arith.constant 0 : index
    %c0_36 = arith.constant 0 : index
    %87 = vector.load %arg3[%c2, %c0_35, %c0_36] : memref<4x64x64xbf16, #tpu.memory_space<vmem>>, vector<1x64x64xbf16>
    %88 = vector.shape_cast %87 : vector<1x64x64xbf16> to vector<64x64xbf16>
    %89 = arith.truncf %84 : vector<64x64xf32> to vector<64x64xbf16>
    %cst_37 = arith.constant dense<0.000000e+00> : vector<64x64xf32>
    %90 = tpu.matmul %88, %89, %cst_37 {dimension_numbers = #tpu.dot_dimension_numbers<[1], [0], [0], [1], [0, 0, 1, 1], [], []>} : vector<64x64xbf16>, vector<64x64xbf16>, vector<64x64xf32> -> vector<64x64xf32>
    %91 = vector.broadcast %85 : vector<64x1xf32> to vector<64x64xf32>
    %92 = arith.addf %90, %91 : vector<64x64xf32>
    %cst_38 = arith.constant 0.000000e+00 : f32
    %93 = vector.broadcast %cst_38 : f32 to vector<64x64xf32>
    %94 = arith.maximumf %92, %93 : vector<64x64xf32>
    %c2_39 = arith.constant 2 : index
    %c0_40 = arith.constant 0 : index
    %c0_41 = arith.constant 0 : index
    %95 = vector.load %arg4[%c2_39, %c0_40, %c0_41] : memref<4x64x64xbf16, #tpu.memory_space<vmem>>, vector<1x64x64xbf16>
    %96 = vector.shape_cast %95 : vector<1x64x64xbf16> to vector<64x64xbf16>
    %97 = arith.truncf %94 : vector<64x64xf32> to vector<64x64xbf16>
    %cst_42 = arith.constant dense<0.000000e+00> : vector<64x64xf32>
    %98 = tpu.matmul %96, %97, %cst_42 {dimension_numbers = #tpu.dot_dimension_numbers<[1], [0], [0], [1], [0, 0, 1, 1], [], []>} : vector<64x64xbf16>, vector<64x64xbf16>, vector<64x64xf32> -> vector<64x64xf32>
    %99 = vector.broadcast %86 : vector<64x1xf32> to vector<64x64xf32>
    %100 = arith.addf %98, %99 : vector<64x64xf32>
    %101 = arith.addf %68, %100 : vector<64x64xf32>
    %cst_43 = arith.constant dense<0.000000e+00> : vector<64xf32>
    %102 = vector.multi_reduction <add>, %101, %cst_43 [0] : vector<64x64xf32> to vector<64xf32>
    %103 = vector.shape_cast %102 : vector<64xf32> to vector<1x64xf32>
    %cst_44 = arith.constant 1.562500e-02 : f32
    %104 = vector.broadcast %cst_44 : f32 to vector<1x64xf32>
    %105 = arith.mulf %103, %104 : vector<1x64xf32>
    %106 = vector.broadcast %105 : vector<1x64xf32> to vector<64x64xf32>
    %107 = arith.subf %101, %106 : vector<64x64xf32>
    %108 = arith.mulf %107, %107 : vector<64x64xf32>
    %cst_45 = arith.constant dense<0.000000e+00> : vector<64xf32>
    %109 = vector.multi_reduction <add>, %108, %cst_45 [0] : vector<64x64xf32> to vector<64xf32>
    %110 = vector.shape_cast %109 : vector<64xf32> to vector<1x64xf32>
    %cst_46 = arith.constant 1.562500e-02 : f32
    %111 = vector.broadcast %cst_46 : f32 to vector<1x64xf32>
    %112 = arith.mulf %110, %111 : vector<1x64xf32>
    %cst_47 = arith.constant 9.99999974E-6 : f32
    %113 = vector.broadcast %cst_47 : f32 to vector<1x64xf32>
    %114 = arith.addf %112, %113 : vector<1x64xf32>
    %115 = math.rsqrt %114 : vector<1x64xf32>
    %116 = vector.broadcast %115 : vector<1x64xf32> to vector<64x64xf32>
    %117 = arith.mulf %107, %116 : vector<64x64xf32>
    %118 = vector.extract_strided_slice %2 {offsets = [0, 3], sizes = [64, 1], strides = [1, 1]} : vector<64x8xf32> to vector<64x1xf32>
    %119 = vector.extract_strided_slice %2 {offsets = [0, 7], sizes = [64, 1], strides = [1, 1]} : vector<64x8xf32> to vector<64x1xf32>
    %c3 = arith.constant 3 : index
    %c0_48 = arith.constant 0 : index
    %c0_49 = arith.constant 0 : index
    %120 = vector.load %arg3[%c3, %c0_48, %c0_49] : memref<4x64x64xbf16, #tpu.memory_space<vmem>>, vector<1x64x64xbf16>
    %121 = vector.shape_cast %120 : vector<1x64x64xbf16> to vector<64x64xbf16>
    %122 = arith.truncf %117 : vector<64x64xf32> to vector<64x64xbf16>
    %cst_50 = arith.constant dense<0.000000e+00> : vector<64x64xf32>
    %123 = tpu.matmul %121, %122, %cst_50 {dimension_numbers = #tpu.dot_dimension_numbers<[1], [0], [0], [1], [0, 0, 1, 1], [], []>} : vector<64x64xbf16>, vector<64x64xbf16>, vector<64x64xf32> -> vector<64x64xf32>
    %124 = vector.broadcast %118 : vector<64x1xf32> to vector<64x64xf32>
    %125 = arith.addf %123, %124 : vector<64x64xf32>
    %cst_51 = arith.constant 0.000000e+00 : f32
    %126 = vector.broadcast %cst_51 : f32 to vector<64x64xf32>
    %127 = arith.maximumf %125, %126 : vector<64x64xf32>
    %c3_52 = arith.constant 3 : index
    %c0_53 = arith.constant 0 : index
    %c0_54 = arith.constant 0 : index
    %128 = vector.load %arg4[%c3_52, %c0_53, %c0_54] : memref<4x64x64xbf16, #tpu.memory_space<vmem>>, vector<1x64x64xbf16>
    %129 = vector.shape_cast %128 : vector<1x64x64xbf16> to vector<64x64xbf16>
    %130 = arith.truncf %127 : vector<64x64xf32> to vector<64x64xbf16>
    %cst_55 = arith.constant dense<0.000000e+00> : vector<64x64xf32>
    %131 = tpu.matmul %129, %130, %cst_55 {dimension_numbers = #tpu.dot_dimension_numbers<[1], [0], [0], [1], [0, 0, 1, 1], [], []>} : vector<64x64xbf16>, vector<64x64xbf16>, vector<64x64xf32> -> vector<64x64xf32>
    %132 = vector.broadcast %119 : vector<64x1xf32> to vector<64x64xf32>
    %133 = arith.addf %131, %132 : vector<64x64xf32>
    %134 = arith.addf %101, %133 : vector<64x64xf32>
    %c0_56 = arith.constant 0 : index
    %c0_57 = arith.constant 0 : index
    %135 = vector.load %arg5[%c0_56, %c0_57] : memref<4x64xbf16, #tpu.memory_space<vmem>>, vector<4x64xbf16>
    %136 = arith.truncf %134 : vector<64x64xf32> to vector<64x64xbf16>
    %cst_58 = arith.constant dense<0.000000e+00> : vector<4x64xf32>
    %137 = tpu.matmul %135, %136, %cst_58 {dimension_numbers = #tpu.dot_dimension_numbers<[1], [0], [0], [1], [0, 0, 1, 1], [], []>} : vector<4x64xbf16>, vector<64x64xbf16>, vector<4x64xf32> -> vector<4x64xf32>
    %138 = arith.truncf %137 : vector<4x64xf32> to vector<4x64xbf16>
    %c0_59 = arith.constant 0 : index
    %c0_60 = arith.constant 0 : index
    %139 = vector.load %arg6[%c0_59, %c0_60] : memref<64x256xbf16, #tpu.memory_space<vmem>>, vector<64x256xbf16>
    %cst_61 = arith.constant dense<0.000000e+00> : vector<4x256xf32>
    %140 = tpu.matmul %138, %139, %cst_61 {dimension_numbers = #tpu.dot_dimension_numbers<[1], [0], [0], [1], [0, 0, 1, 1], [], []>} : vector<4x64xbf16>, vector<64x256xbf16>, vector<4x256xf32> -> vector<4x256xf32>
    %c0_62 = arith.constant 0 : index
    %c0_63 = arith.constant 0 : index
    %141 = vector.load %arg7[%c0_62, %c0_63] : memref<4x256xf32, #tpu.memory_space<vmem>>, vector<4x256xf32>
    %142 = arith.addf %140, %141 : vector<4x256xf32>
    %143 = arith.mulf %142, %142 : vector<4x256xf32>
    %144 = vector.shape_cast %143 : vector<4x256xf32> to vector<1x4x256xf32>
    %cst_64 = arith.constant dense<0.000000e+00> : vector<1xf32>
    %145 = vector.multi_reduction <add>, %144, %cst_64 [1, 2] : vector<1x4x256xf32> to vector<1xf32>
    %146 = vector.shape_cast %145 : vector<1xf32> to vector<1x1x1xf32>
    %147 = vector.extract %146[0, 0, 0] : f32 from vector<1x1x1xf32>
    %148 = vector.broadcast %147 : f32 to vector<1x1xf32>
    %cst_65 = arith.constant 1.000000e-24 : f32
    %149 = vector.broadcast %cst_65 : f32 to vector<1x1xf32>
    %150 = arith.maximumf %148, %149 : vector<1x1xf32>
    %151 = math.rsqrt %150 : vector<1x1xf32>
    %152 = vector.broadcast %151 : vector<1x1xf32> to vector<4x256xf32>
    %153 = arith.mulf %142, %152 : vector<4x256xf32>
    %154 = vector.shape_cast %153 : vector<4x256xf32> to vector<1x4x256xf32>
    %c0_66 = arith.constant 0 : index
    %c0_67 = arith.constant 0 : index
    %c0_68 = arith.constant 0 : index
    %155 = vector.load %arg8[%c0_66, %c0_67, %c0_68] : memref<1x4x256xf32, #tpu.memory_space<vmem>>, vector<1x4x256xf32>
    tpu.vector_store %arg8[%c0_66, %c0_67, %c0_68], %154 {strides = array<i32>} : memref<1x4x256xf32, #tpu.memory_space<vmem>>, vector<1x4x256xf32>,
    return
  }
  func.func @transform_0(%arg0: i32) -> (i32, i32, i32) {
    %c0_i32 = arith.constant 0 : i32
    %c0_i32_0 = arith.constant 0 : i32
    %c0_i32_1 = arith.constant 0 : i32
    return %arg0, %c0_i32, %c0_i32_0 : i32, i32, i32
  }
  func.func @transform_1(%arg0: i32) -> (i32, i32) {
    %c0_i32 = arith.constant 0 : i32
    %c0_i32_0 = arith.constant 0 : i32
    %c0_i32_1 = arith.constant 0 : i32
    return %c0_i32, %c0_i32_0 : i32, i32
  }
  func.func @transform_2(%arg0: i32) -> (i32, i32, i32) {
    %c0_i32 = arith.constant 0 : i32
    %c0_i32_0 = arith.constant 0 : i32
    %c0_i32_1 = arith.constant 0 : i32
    %c0_i32_2 = arith.constant 0 : i32
    return %c0_i32, %c0_i32_0, %c0_i32_1 : i32, i32, i32
  }
  func.func @transform_3(%arg0: i32) -> (i32, i32, i32) {
    %c0_i32 = arith.constant 0 : i32
    %c0_i32_0 = arith.constant 0 : i32
    %c0_i32_1 = arith.constant 0 : i32
    %c0_i32_2 = arith.constant 0 : i32
    return %c0_i32, %c0_i32_0, %c0_i32_1 : i32, i32, i32
  }
  func.func @transform_4(%arg0: i32) -> (i32, i32) {
    %c0_i32 = arith.constant 0 : i32
    %c0_i32_0 = arith.constant 0 : i32
    %c0_i32_1 = arith.constant 0 : i32
    return %c0_i32, %c0_i32_0 : i32, i32
  }
  func.func @transform_5(%arg0: i32) -> (i32, i32) {
    %c0_i32 = arith.constant 0 : i32
    %c0_i32_0 = arith.constant 0 : i32
    %c0_i32_1 = arith.constant 0 : i32
    return %c0_i32, %c0_i32_0 : i32, i32
  }
  func.func @transform_6(%arg0: i32) -> (i32, i32) {
    %c0_i32 = arith.constant 0 : i32
    %c0_i32_0 = arith.constant 0 : i32
    %c0_i32_1 = arith.constant 0 : i32
    return %c0_i32, %c0_i32_0 : i32, i32
  }
  func.func @transform_7(%arg0: i32) -> (i32, i32, i32) {
    %c0_i32 = arith.constant 0 : i32
    %c0_i32_0 = arith.constant 0 : i32
    %c0_i32_1 = arith.constant 0 : i32
    return %arg0, %c0_i32, %c0_i32_0 : i32, i32, i32
  }
}

</mosaic_0001>

<bundles_post_ra>
// kernel: tpu_custom_call.1
= control target key start
LH: loop header
LB: loop body
LE: loop exit
PB: predicated region body
PF: predicated region fallthrough
CT: control target
= control target key end

     0   :  { %12 = vsyncpa [#allocation3], 0  ;;  %s3453_s0 = inlined_call_operand.hbm [shape: f32[2,64,64], index: 0, kind: input, shape index: {}]   ;;  %s3454_s1 = inlined_call_operand.vmem [shape: f32[64,8], index: 1, kind: input, shape index: {}]   ;;  %s3455_s2 = inlined_call_operand.hbm [shape: bf16[4,64,64], index: 2, kind: input, shape index: {}]   ;;  %s3456_s3 = inlined_call_operand.hbm [shape: bf16[4,64,64], index: 3, kind: input, shape index: {}]   ;;  %s3457_s4 = inlined_call_operand.vmem [shape: bf16[4,64], index: 4, kind: input, shape index: {}]   ;;  %s3458_s5 = inlined_call_operand.vmem [shape: bf16[64,256], index: 5, kind: input, shape index: {}]   ;;  %s3459_s6 = inlined_call_operand.vmem [shape: f32[4,256], index: 6, kind: input, shape index: {}]   ;;  %s3460_s7 = inlined_call_operand.hbm [shape: f32[2,4,256], index: 7, kind: output, shape index: {}]  }
   0x1   :  { %14 = vsyncpa [#allocation3 + $0x1], 0 }
   0x2   :  { %15 = vsyncpa [#allocation6], 0 }
   0x3   :  { %16 = vsyncpa [#allocation4], 0 }
   0x4   :  { %18 = vsyncpa [#allocation4 + $0x1], 0  ;;  %s2785_s24 = smov 0   ;;  %s2787_s25 = smov 0  }
   0x5   :  { %s2789_s26 = smov 0   ;;  %s2791_s27 = smov 0  }
   0x6 LB: > { %s2806_s28 = sadd.s32 4294967295, %s2725_s27   ;;  %s2104_s29 = sadd.s32 4294967294, %s2725_s27   ;;  %s2725_s27 = sphi %s2791_s27, %s3480_s27   ;;  %s2721_s26 = sphi %s2789_s26, %s3479_s26   ;;  %s2717_s25 = sphi %s2787_s25, %s3478_s25   ;;  %s2713_s24 = sphi %s2785_s24, %s3477_s24  }
   0x7   : > { %p44_p0 = scmp.ne.s32.totalorder %s2717_s25, %s2713_s24  ;;  %p3461_p1 = scmp.eq.s32.totalorder %s2806_s28, 0 }
   0x8   : > { %p200_p3 = scmp.eq.s32.totalorder %s2104_s29, 1  ;;  %p2105_p5 = scmp.ge.s32.totalorder %s2725_s27, 1 }
   0x9   : > { %p2815_p4 = por %p3461_p1, %p44_p0  ;;  %p207_p7 = scmp.lt.s32.totalorder %s2725_s27, 3 }
   0xa   : > { %p2820_p6 = por %p200_p3, %p44_p0  ;;  %s2727_s10 = smov [#allocation5]  }
   0xb   : > { %s3464_s30 = scalar_select %p2815_p4, 1, 0 }
   0xc   : > { %s3465_s8 = scalar_select %p2820_p6, 1, 0 }
   0xd   : > { %p2825_p8 = pnand %p2105_p5, %p207_p7  ;;  %s222_s11 = sshll.u32 %s2727_s10, 4  ;;  %s2829_s11 = int_to_ptr.vmem [resolvable:$true] %s222_s11 }
   0xe   : > { %s2728_s13 = smov [#allocation7]   ;;  %s2569_s17 = scalar_lea.hbm %s3455_s2, 2048 }
   0xf   : > { %p2421_p9 = pneg %p2825_p8  ;;  %s235_s14 = sshll.u32 %s2728_s13, 4  ;;  %s2840_s14 = int_to_ptr.vmem [resolvable:$true] %s235_s14 }
  0x10   : > { %p2570_p12 = scmp.ne.s32.totalorder %s3455_s2, %s2569_s17  ;;  %p2576_p5 = scmp.lt.u32.totalorder %s2569_s17, %s3455_s2 }
  0x11   : > { %p2836_p11 = pnand %p2421_p9, %p3461_p1 }
  0x13   : > { %p2571_p13 = pneg %p2836_p11 }
  0x15   : > { %p2572_p0 = pnand %p2571_p13, %p2570_p12 }
  0x17   : > { %p2573_p3 = pneg %p2572_p0 }
  0x19   : > { %p2578_p7 = pnand %p2576_p5, %p2573_p3 }
  0x1b   : > { %2581 = shalt.err (!%p2578_p7)
}
  0x1c   : > { %s2582_s22 = scalar_lea.vmem %s2829_s11, 2048  ;;  %p2590_p2 = scmp.lt.s32.totalorder %s2829_s11, %s2829_s11 }
  0x1d   : > { %p2583_p9 = scmp.ne.s32.totalorder %s2829_s11, %s2582_s22  ;;  %p2591_p12 = scmp.lt.s32.totalorder %s2582_s22, %s2582_s22 }
  0x1f   : > { %p2585_p10 = pnand %p2583_p9, %p2571_p13  ;;  %p2592_p0 = por %p2591_p12, %p2590_p2 }
  0x21   : > { %p2586_p1 = pneg %p2585_p10 }
  0x23   : > { %p2593_p6 = pnand %p2592_p0, %p2586_p1 }
  0x25   : > { %2596 = shalt.err (!%p2593_p6)
}
  0x26   : > { %s2729_s23 = smov 64   ;;  %s2730_s29 = smov 4  }
  0x27   : > { %2424 = dma.hbm_to_vmem [thread:$0]  (!%p2836_p11), %s3455_s2, 2048, %s2829_s11, [#allocation6], %s2729_s23, %s2729_s23, %s2730_s29  }
  0x28   : > { %s2597_s17 = scalar_lea.hbm %s3456_s3, 2048 }
  0x29   : > { %p2598_p2 = scmp.ne.s32.totalorder %s3456_s3, %s2597_s17  ;;  %p2604_p10 = scmp.lt.u32.totalorder %s2597_s17, %s3456_s3 }
  0x2b   : > { %p2600_p1 = pnand %p2598_p2, %p2571_p13 }
  0x2d   : > { %p2601_p6 = pneg %p2600_p1 }
  0x2f   : > { %p2606_p3 = pnand %p2604_p10, %p2601_p6 }
  0x31   : > { %2609 = shalt.err (!%p2606_p3)
}
  0x32   : > { %s2610_s11 = scalar_lea.vmem %s2840_s14, 2048  ;;  %p2618_p12 = scmp.lt.s32.totalorder %s2840_s14, %s2840_s14 }
  0x33   : > { %p2611_p5 = scmp.ne.s32.totalorder %s2840_s14, %s2610_s11  ;;  %p2619_p0 = scmp.lt.s32.totalorder %s2610_s11, %s2610_s11 }
  0x35   : > { %p2613_p7 = pnand %p2611_p5, %p2571_p13  ;;  %p2620_p2 = por %p2619_p0, %p2618_p12 }
  0x37   : > { %p2614_p9 = pneg %p2613_p7 }
  0x39   : > { %p2621_p1 = pnand %p2620_p2, %p2614_p9 }
  0x3b   : > { %2624 = shalt.err (!%p2621_p1)
}
  0x3c   : > { %2427 = dma.hbm_to_vmem [thread:$0]  (!%p2836_p11), %s3456_s3, 2048, %s2840_s14, [#allocation6], %s2729_s23, %s2729_s23, %s2730_s29  }
  0x3d   : > { %s2895_s13 = sadd.s32 1, %s2725_s27   ;;  %s31_s12 = sadd.s32 1, %s2721_s26 }
  0x3e   : > { %s28_s15 = ssub.s32 %s2725_s27, %s2895_s13  ;;  %p38_p13 = scmp.ne.s32.totalorder %s2721_s26, %s2717_s25 }
  0x3f   : > { %p29_p6 = scmp.eq.s32.totalorder %s28_s15, 0  ;;  %p39_p10 = scmp.eq.s32.totalorder %s2725_s27, 0 }
  0x40   : > { %p3468_p3 = scmp.eq.s32.totalorder %s2806_s28, 1  ;;  %p2438_p7 = scmp.lt.s32.totalorder %s2725_s27, 2 }
  0x41   : > { %s2911_s17 = scalar_select %p29_p6, %s2721_s26, %s31_s12  }
  0x42   : > { %p2905_p5 = por %p3468_p3, %p38_p13  ;;  %p40_p9 = por %p39_p10, %p38_p13 }
  0x43   : > { %s258_s18 = sand.u32 1, %s2721_s26   ;;  %s2196_s14 = sshll.u32 %s2725_s27, 10 }
  0x44   : > { %s3469_s16 = scalar_select %p2905_p5, 1, 0 }
  0x45   : > { %s2109_s19 = sshll.u32 %s258_s18, 6  ;;  %s2918_s20 = scalar_lea.hbm %s3453_s0, %s2196_s14 }
  0x46   : > { %s262_s21 = scalar_lea.vmem [#allocation2], %s2109_s19  ;;  %p2922_p11 = pnand %p2438_p7, %p40_p9 }
  0x47   : > { %s269_s11 = sshll.u32 %s262_s21, 4  ;;  %s2926_s10 = scalar_lea.sflag [#allocation3], %s258_s18  ;;  %s2920_s11 = int_to_ptr.vmem [resolvable:$true] %s269_s11 }
  0x48   : > { %s2625_s12 = scalar_lea.hbm %s2918_s20, 1024  ;;  %p2627_p0 = pneg %p2922_p11 }
  0x49   : > { %p2626_p12 = scmp.ne.s32.totalorder %s2918_s20, %s2625_s12  ;;  %s2630_s14 = scalar_lea.hbm %s3453_s0, 2048 }
  0x4a   : > { %p2631_p13 = scmp.lt.u32.totalorder %s2918_s20, %s3453_s0  ;;  %p2632_p6 = scmp.lt.u32.totalorder %s2630_s14, %s2625_s12 }
  0x4b   : > { %p2628_p2 = pnand %p2627_p0, %p2626_p12  ;;  %p2634_p3 = scmp.lt.u32.totalorder %s2625_s12, %s2918_s20 }
  0x4c   : > { %p2633_p10 = por %p2632_p6, %p2631_p13 }
  0x4d   : > { %p2629_p1 = pneg %p2628_p2 }
  0x4e   : > { %p2635_p7 = por %p2634_p3, %p2633_p10 }
  0x50   : > { %p2636_p9 = pnand %p2635_p7, %p2629_p1 }
  0x52   : > { %2639 = shalt.err (!%p2636_p9)
}
  0x53   : > { %s2640_s18 = scalar_lea.vmem %s2920_s11, 1024  ;;  %s2731_s21 = smov [#allocation2]  }
  0x54   : > { %p2641_p12 = scmp.ne.s32.totalorder %s2920_s11, %s2640_s18  ;;  %s2645_s15 = sshll.u32 %s2731_s21, 4  ;;  %s2646_s15 = int_to_ptr.vmem [resolvable:$false] %s2645_s15 }
  0x55   : > { %s2647_s19 = scalar_lea.vmem %s2646_s15, 2048  ;;  %p2648_p4 = scmp.lt.s32.totalorder %s2920_s11, %s2646_s15 }
  0x56   : > { %p2643_p2 = pnand %p2641_p12, %p2627_p0  ;;  %p2649_p13 = scmp.lt.s32.totalorder %s2647_s19, %s2640_s18 }
  0x58   : > { %p2644_p5 = pneg %p2643_p2  ;;  %p2650_p6 = por %p2649_p13, %p2648_p4 }
  0x5a   : > { %p2651_p10 = pnand %p2650_p6, %p2644_p5 }
  0x5c   : > { %2654 = shalt.err (!%p2651_p10)
}
  0x5d   : > { %s2732_s12 = smov 128   ;;  %s2733_s14 = smov 8  }
  0x5e   : > { %2431 = dma.hbm_to_vmem [thread:$0]  (!%p2922_p11), %s2918_s20, 1024, %s2920_s11, %s2926_s10, %s2732_s12, %s2732_s12, %s2733_s14  }
  0x5f   : > { %281 = sbr.rel (%p2825_p8) target bundleno = 2998 (0xbb6), region = 48  ;;  %s2957_s23 = sand.u32 (!%p2825_p8), 1, %s2717_s25  }
  0x60   : > { %s2113_s29 = sshll.u32 (!%p2825_p8), %s2957_s23, 6  ;;  %s284_s18 = scalar_lea.sflag (!%p2825_p8), [#allocation3], %s2957_s23 }
  0x61   : > { %s287_s21 = scalar_lea.vmem (!%p2825_p8), [#allocation2], %s2113_s29  ;;  %p3471_p4 = scmp.ne.s32.totalorder (!%p2825_p8), %s3464_s30, 0 }
  0x66   : > { %2700 = dma.done.wait (%p3471_p4), %s284_s18, 1024  }
  0x67   : > { %2702 = vsyncadd (%p3471_p4), %s284_s18, 4294966272  ;;  %p3472_p5 = scmp.eq.s32.totalorder %s2806_s28, 0 }
  0x69   : > { %2704 = dma.done.wait (%p3472_p5), [#allocation6], 4096   ;;  %p3473_p11 = pmov %p3472_p5 }
  0x6a   : > { %v2734_v0 = vmov 0   ;;  %vm343_vm0 = vcmask 523264   ;;  %v2971_v1 = vld [vmem:[%s287_s21] sm:$0xff]  ;;  %v2973_v2 = vld [vmem:[%s287_s21 + $0x8] sm:$0xff]  ;;  %v2975_v3 = vld [vmem:[%s287_s21 + $0x10] sm:$0xff]  ;;  %vm2743_vm1 = vmmov 0  }
  0x6b   : > { %2706 = vsyncadd (%p3473_p11), [#allocation6], 4294963200  ;;  %2490 = vset.pattern.permute.xlu0 %v2734_v0  ;;  %2491 = vset.pattern.permute.xlu1 %v2734_v0  ;;  %v2977_v4 = vld [vmem:[%s287_s21 + $0x18] sm:$0xff]  ;;  %v344_v5 = vsel %vm343_vm0, %v2971_v1, 0.0  ;;  %v345_v6 = vsel %vm343_vm0, %v2973_v2, 0.0  ;;  %v347_v7 = vsel %vm343_vm0, %v2975_v3, 0.0 }
  0x6c   : > { %v2985_v8 = vld [vmem:[%s287_s21 + $0x20] sm:$0xff]  ;;  %v346_v9 = vadd.f32 %v345_v6, %v344_v5  ;;  %v349_v11 = vsel %vm343_vm0, %v2977_v4, 0.0  ;;  %v2989_v12 = vld [vmem:[%s287_s21 + $0x28] sm:$0xff]  ;;  %v2992_v14 = vld [vmem:[%s287_s21 + $0x30] sm:$0xff]  ;;  %vm1977_vm2 = vcmask 1043456   ;;  %s2116_s9 = sshll.u32 %s2957_s23, 3 }
  0x6d   : > { %v2506_v10 = vld [vmem:[#allocation5] sm:$0xff]   ;;  %v351_v15 = vsel %vm343_vm0, %v2985_v8, 0.0  ;;  %v2996_v16 = vld [vmem:[%s287_s21 + $0x38] sm:$0xff]  ;;  %v353_v18 = vsel %vm343_vm0, %v2989_v12, 0.0  ;;  %v3008_v20 = vld [vmem:[%s3454_s1 + $0x10] sm:$0xff]  ;;  %v355_v22 = vsel %vm343_vm0, %v2992_v14, 0.0 }
  0x6e   : > { %v348_v13 = vadd.f32 %v347_v7, %v346_v9  ;;  %2275 = vmatprep.mubr.msk.bf16.mxu0 %vm343_vm0, %v2506_v10  ;;  %v3003_v19 = vld [vmem:[%s3454_s1] sm:$0xff]  ;;  %438 = vperm.xlu1 %2491, %v3008_v20   ;;  %v357_v23 = vsel %vm343_vm0, %v2996_v16, 0.0  ;;  %v3019_v24 = vld [vmem:[%s3454_s1 + $0x8] sm:$0xff]  ;;  %v3024_v25 = vld [vmem:[%s3454_s1 + $0x18] sm:$0xff]  ;;  %s2197_s20 = sshll.u32 %s2806_s28, 7  ;;  %s325_s11 = scalar_lea.vmem [#allocation8], %s2116_s9 }
  0x6f   : > { %428 = vperm.xlu0 %2490, %v3003_v19   ;;  %v3029_v27 = vld [vmem:[%s3454_s1 + $0x20] sm:$0xff]  ;;  %v3034_v28 = vld [vmem:[%s3454_s1 + $0x28] sm:$0xff]  ;;  %v3041_v31 = vld [vmem:[%s3454_s1 + $0x30] sm:$0xff]  ;;  %s2015_s22 = sshll.u32 %s325_s11, 4  ;;  %s3409_s19 = scalar_lea.hbm %s3460_s7, %s2197_s20  ;;  %s3411_s22 = int_to_ptr.vmem [resolvable:$true] %s2015_s22 }
  0x70   : > { %v350_v17 = vadd.f32 %v349_v11, %v348_v13  ;;  %v3046_v32 = vld [vmem:[%s3454_s1 + $0x38] sm:$0xff]  ;;  %s2001_s12 = scalar_lea.sflag [#allocation4], %s2957_s23  ;;  %s2655_s14 = scalar_lea.vmem %s3411_s22, 128 }
  0x71   : > { %p2656_p8 = scmp.ne.s32.totalorder %s3411_s22, %s2655_s14  ;;  %p3474_p0 = scmp.ne.s32.totalorder %s3469_s16, 0 }
  0x72   : > { %v352_v21 = vadd.f32 %v351_v15, %v350_v17  ;;  %443 = vperm.xlu1 %2491, %v3024_v25   ;;  %s2744_s28 = smov [#allocation8]  }
  0x73   : > { %433 = vperm.xlu0 %2490, %v3019_v24   ;;  %p2657_p1 = pnand %p2656_p8, %p3474_p0  ;;  %s2659_s29 = sshll.u32 %s2744_s28, 4  ;;  %s2660_s29 = int_to_ptr.vmem [resolvable:$false] %s2659_s29 }
  0x74   : > { %v354_v26 = vadd.f32 %v353_v18, %v352_v21  ;;  %s2661_s18 = scalar_lea.vmem %s2660_s29, 256  ;;  %p2662_p7 = scmp.lt.s32.totalorder %s3411_s22, %s2660_s29 }
  0x75   : > { %p2658_p3 = pneg %p2657_p1  ;;  %p2663_p9 = scmp.lt.s32.totalorder %s2661_s18, %s2655_s14 }
  0x76   : > { %v356_v29 = vadd.f32 %v355_v22, %v354_v26  ;;  %453 = vperm.xlu1 %2491, %v3034_v28  }
  0x77   : > { %448 = vperm.xlu0 %2490, %v3029_v27   ;;  %p2664_p12 = por %p2663_p9, %p2662_p7 }
  0x78   : > { %v358_v30 = vadd.f32 %v357_v23, %v356_v29 }
  0x79   : > { %p2665_p2 = pnand %p2664_p12, %p2658_p3 }
  0x7a   : > { %v359_v33 = vrot.slane %v358_v30, 4  ;;  %463 = vperm.xlu1 %2491, %v3046_v32  }
  0x7b   : > { %458 = vperm.xlu0 %2490, %v3041_v31  }
  0x7c   : > { %v360_v34 = vadd.f32 %v359_v33, %v358_v30 }
  0x7e   : > { %v361_v35 = vrot.slane %v360_v34, 2 }
  0x80   : > { %v362_v36 = vadd.f32 %v361_v35, %v360_v34 }
  0x82   : > { %v363_v37 = vrot.slane %v362_v36, 1 }
  0x84   : > { %v364_v38 = vadd.f32 %v363_v37, %v362_v36 }
  0x86   : > { %v365_v39 = vmul.f32 0.015625, %v364_v38 }
  0x88   : > { %v366_v40 = vsub.f32 %v2971_v1, %v365_v39  ;;  %v367_v41 = vsub.f32 %v2973_v2, %v365_v39  ;;  %v368_v42 = vsub.f32 %v2975_v3, %v365_v39  ;;  %v369_v43 = vsub.f32 %v2977_v4, %v365_v39 }
  0x89   : > { %v370_v44 = vsub.f32 %v2985_v8, %v365_v39  ;;  %v371_v45 = vsub.f32 %v2989_v12, %v365_v39  ;;  %v372_v50 = vsub.f32 %v2992_v14, %v365_v39  ;;  %v373_v56 = vsub.f32 %v2996_v16, %v365_v39 }
  0x8a   : > { %v374_v46 = vmul.f32 %v366_v40, %v366_v40  ;;  %v375_v47 = vmul.f32 %v367_v41, %v367_v41  ;;  %v376_v48 = vmul.f32 %v368_v42, %v368_v42  ;;  %v377_v49 = vmul.f32 %v369_v43, %v369_v43 }
  0x8b   : > { %v378_v51 = vmul.f32 %v370_v44, %v370_v44  ;;  %v379_v57 = vmul.f32 %v371_v45, %v371_v45  ;;  %v380_v60 = vmul.f32 %v372_v50, %v372_v50  ;;  %v381_v63 = vmul.f32 %v373_v56, %v373_v56 }
  0x8c   : > { %v382_v52 = vsel %vm343_vm0, %v374_v46, 0.0  ;;  %v383_v53 = vsel %vm343_vm0, %v375_v47, 0.0  ;;  %v385_v54 = vsel %vm343_vm0, %v376_v48, 0.0  ;;  %v387_v58 = vsel %vm343_vm0, %v377_v49, 0.0 }
  0x8d   : > { %v384_v55 = vadd.f32 %v383_v53, %v382_v52  ;;  %v389_v61 = vsel %vm343_vm0, %v378_v51, 0.0  ;;  %v391_v5 = vsel %vm343_vm0, %v379_v57, 0.0  ;;  %v393_v7 = vsel %vm343_vm0, %v380_v60, 0.0  ;;  %v2507_v52 = vld [vmem:[#allocation5 + $0x8] sm:$0xff]  }
  0x8e   : > { %v395_v10 = vsel %vm343_vm0, %v381_v63, 0.0 }
  0x8f   : > { %v386_v59 = vadd.f32 %v385_v54, %v384_v55 }
  0x91   : > { %v388_v62 = vadd.f32 %v387_v58, %v386_v59 }
  0x93   : > { %v390_v6 = vadd.f32 %v389_v61, %v388_v62 }
  0x95   : > { %v392_v9 = vadd.f32 %v391_v5, %v390_v6 }
  0x97   : > { %v394_v11 = vadd.f32 %v393_v7, %v392_v9 }
  0x99   : > { %v396_v13 = vadd.f32 %v395_v10, %v394_v11 }
  0x9b   : > { %v397_v15 = vrot.slane %v396_v13, 4 }
  0x9d   : > { %v398_v17 = vadd.f32 %v397_v15, %v396_v13 }
  0x9f   : > { %v399_v18 = vrot.slane %v398_v17, 2 }
  0xa1   : > { %v400_v21 = vadd.f32 %v399_v18, %v398_v17 }
  0xa3   : > { %v401_v22 = vrot.slane %v400_v21, 1 }
  0xa5   : > { %v402_v23 = vadd.f32 %v401_v22, %v400_v21 }
  0xa7   : > { %v403_v26 = vmul.f32 0.015625, %v402_v23 }
  0xa9   : > { %v404_v29 = vadd.f32 1e-05, %v403_v26 }
  0xab   : > { %2551 = vrsqrt.f32 %v404_v29 }
  0xb5   : > { %v2552_v30 = vpop.eup %2551 }
  0xb6   : > { %v406_v33 = vmul.f32 %v2552_v30, %v366_v40  ;;  %v407_v34 = vmul.f32 %v2552_v30, %v367_v41  ;;  %v408_v35 = vmul.f32 %v2552_v30, %v368_v42  ;;  %v409_v36 = vmul.f32 %v2552_v30, %v369_v43  ;;  %v2508_v40 = vld [vmem:[#allocation5 + $0x10] sm:$0xff]   ;;  %v2509_v41 = vld [vmem:[#allocation5 + $0x18] sm:$0xff]   ;;  %v2510_v42 = vld [vmem:[#allocation7] sm:$0xff]  }
  0xb7   : > { %v410_v39 = vmul.f32 %v2552_v30, %v370_v44  ;;  %v411_v46 = vmul.f32 %v2552_v30, %v371_v45  ;;  %v412_v48 = vmul.f32 %v2552_v30, %v372_v50  ;;  %v413_v49 = vmul.f32 %v2552_v30, %v373_v56  ;;  %2291 = vmatprep.mubr.msk.bf16.mxu1 %vm343_vm0, %v2510_v42 }
  0xb8   : > { %v422_v37 = vpack.c.bf16 %v407_v34, %v406_v33  ;;  %v423_v38 = vpack.c.bf16 %v409_v36, %v408_v35  ;;  %v2735_v43 = vmov 4  }
  0xb9   : > { %v424_v47 = vpack.c.bf16 %v411_v46, %v410_v39  ;;  %v425_v51 = vpack.c.bf16 %v413_v49, %v412_v48  ;;  %2493 = vset.pattern.permute.xlu1 %v2735_v43  ;;  %2492 = vset.pattern.permute.xlu0 %v2735_v43  ;;  %v2511_v39 = vld [vmem:[#allocation7 + $0x8] sm:$0xff]   ;;  %v2512_v46 = vld [vmem:[#allocation7 + $0x10] sm:$0xff]   ;;  %v2514_v48 = vld [vmem:[#allocation5 + $0x20] sm:$0xff]   ;;  %v2736_v49 = vmov 1  }
  0xba   : > { %2267 = vmatprep.subr.bf16.mxu0 %v422_v37  ;;  %588 = vperm.xlu1 %2493, %v3019_v24  }
  0xbb   : > { %2268 = vmatpush3.bf16.msra.mxu0 %v422_v37  ;;  %584 = vperm.xlu0 %2492, %v3003_v19  }
  0xbc   : > { %2269 = vmatprep.subr.bf16.mxu0 %v423_v38 }
  0xbe   : > { %592 = vperm.xlu1 %2493, %v3008_v20  }
  0xbf   : > { %2270 = vmatpush3.bf16.msra.mxu0 %v423_v38  ;;  %596 = vperm.xlu0 %2492, %v3024_v25  }
  0xc0   : > { %2271 = vmatprep.subr.bf16.mxu0 %v424_v47 }
  0xc2   : > { %600 = vperm.xlu1 %2493, %v3029_v27  }
  0xc3   : > { %2272 = vmatpush3.bf16.msra.mxu0 %v424_v47  ;;  %604 = vperm.xlu0 %2492, %v3034_v28   ;;  %v2513_v47 = vld [vmem:[#allocation7 + $0x18] sm:$0xff]  }
  0xc4   : > { %2273 = vmatprep.subr.bf16.mxu0 %v425_v51 }
  0xc6   : > { %608 = vperm.xlu1 %2493, %v3041_v31  }
  0xc7   : > { %2274 = vmatpush3.bf16.msra.mxu0 %v425_v51  ;;  %612 = vperm.xlu0 %2492, %v3046_v32  }
  0xca   : > { %2276 = vmatmul.mubr.msk.bf16.vlgmr.msra.gmra.mrb[0].mxu0 %vm343_vm0, %v2507_v52  ;;  %2494 = vset.pattern.permute.xlu1 %v2736_v49 }
  0xcb   : > { %2279 = vmatprep.mubr.msk.bf16.mxu0 %vm343_vm0, %v2508_v40  ;;  %2495 = vset.pattern.permute.xlu0 %v2736_v49 }
  0xcc   : > { %804 = vperm.xlu1 %2494, %v3003_v19   ;;  %808 = vperm.xlu0 %2495, %v3019_v24  }
  0xd0   : > { %812 = vperm.xlu1 %2494, %v3008_v20   ;;  %820 = vperm.xlu0 %2495, %v3029_v27  }
  0xd2   : > { %2280 = vmatmul.mubr.msk.bf16.gmra.mrb[4].mxu0 %vm343_vm0, %v2509_v41 }
  0xd3   : > { %2307 = vmatprep.mubr.msk.bf16.mxu0 %vm343_vm0, %v2514_v48 }
  0xd4   : > { %816 = vperm.xlu1 %2494, %v3024_v25   ;;  %828 = vperm.xlu0 %2495, %v3041_v31  }
  0xd8   : > { %824 = vperm.xlu1 %2494, %v3034_v28  }
  0xdc   : > { %832 = vperm.xlu1 %2494, %v3046_v32  }
  0xed   : > { %v439_v45 = vpop.permute.xlu1 %438 }
  0xee   : > { %v429_v44 = vpop.permute.xlu0 %428 }
  0xf1   : > { %v444_v53 = vpop.permute.xlu1 %443 }
  0xf2   : > { %v434_v50 = vpop.permute.xlu0 %433 }
  0xf5   : > { %v454_v62 = vpop.permute.xlu1 %453 }
  0xf6   : > { %v449_v57 = vpop.permute.xlu0 %448 }
  0xf9   : > { %v464_v21 = vpop.permute.xlu1 %463 }
  0xfa   : > { %v459_v11 = vpop.permute.xlu0 %458 }
 0x139   : > { %v589_v51 = vpop.permute.xlu1 %588 }
 0x13a   : > { %v585_v52 = vpop.permute.xlu0 %584 }
 0x13d   : > { %v593_v40 = vpop.permute.xlu1 %592 }
 0x13e   : > { %v597_v41 = vpop.permute.xlu0 %596 }
 0x19d   : > { %v2277_v54 = vpop.f32.mrb[0].mxu0 }
 0x19e   : > { %v541_v55 = vadd.f32 %v2277_v54, %v439_v45  ;;  %v532_v56 = vpop.f32.mrb[1].mxu0 }
 0x19f   : > { %v533_v58 = vadd.f32 %v532_v56, %v429_v44  ;;  %v2278_v59 = vpop.f32.mrb[2].mxu0 }
 0x1a0   : > { %v544_v60 = vadd.f32 %v2278_v59, %v444_v53  ;;  %v535_v61 = vpop.f32.mrb[3].mxu0  ;;  %v565_v5 = vmax.f32 %v541_v55, 0.0  ;;  %v601_v53 = vpop.permute.xlu1 %600 }
 0x1a1   : > { %v536_v63 = vadd.f32 %v535_v61, %v434_v50  ;;  %v563_v7 = vmax.f32 %v533_v58, 0.0  ;;  %v605_v58 = vpop.permute.xlu0 %604 }
 0x1a2   : > { %v566_v6 = vmax.f32 %v544_v60, 0.0 }
 0x1a3   : > { %v564_v9 = vmax.f32 %v536_v63, 0.0 }
 0x1a4   : > { %v580_v10 = vpack.c.bf16 %v566_v6, %v565_v5  ;;  %v609_v5 = vpop.permute.xlu1 %608 }
 0x1a5   : > { %v2281_v13 = vpop.f32.mrb[4].mxu0  ;;  %v579_v15 = vpack.c.bf16 %v564_v9, %v563_v7 }
 0x1a6   : > { %v557_v17 = vadd.f32 %v2281_v13, %v459_v11  ;;  %v548_v18 = vpop.f32.mrb[5].mxu0  ;;  %v613_v11 = vpop.permute.xlu0 %612 }
 0x1a7   : > { %v549_v22 = vadd.f32 %v548_v18, %v449_v57  ;;  %v2282_v23 = vpop.f32.mrb[6].mxu0  ;;  %2283 = vmatprep.subr.bf16.mxu1 %v579_v15 }
 0x1a8   : > { %v560_v26 = vadd.f32 %v2282_v23, %v464_v21  ;;  %v551_v29 = vpop.f32.mrb[7].mxu0  ;;  %2284 = vmatpush3.bf16.msra.mxu1 %v579_v15  ;;  %v569_v33 = vmax.f32 %v557_v17, 0.0 }
 0x1a9   : > { %v552_v30 = vadd.f32 %v551_v29, %v454_v62  ;;  %2285 = vmatprep.subr.bf16.mxu1 %v580_v10  ;;  %v567_v35 = vmax.f32 %v549_v22, 0.0 }
 0x1aa   : > { %v570_v34 = vmax.f32 %v560_v26, 0.0 }
 0x1ab   : > { %v568_v36 = vmax.f32 %v552_v30, 0.0 }
 0x1ac   : > { %v582_v37 = vpack.c.bf16 %v570_v34, %v569_v33  ;;  %2286 = vmatpush3.bf16.msra.mxu1 %v580_v10 }
 0x1ad   : > { %v581_v38 = vpack.c.bf16 %v568_v36, %v567_v35 }
 0x1af   : > { %2287 = vmatprep.subr.bf16.mxu1 %v581_v38 }
 0x1b0   : > { %2288 = vmatpush3.bf16.msra.mxu1 %v581_v38 }
 0x1b1   : > { %2289 = vmatprep.subr.bf16.mxu1 %v582_v37 }
 0x1b4   : > { %2290 = vmatpush3.bf16.msra.mxu1 %v582_v37 }
 0x1b7   : > { %2292 = vmatmul.mubr.msk.bf16.vlgmr.msra.gmra.mrb[0].mxu1 %vm343_vm0, %v2511_v39 }
 0x1b8   : > { %2295 = vmatprep.mubr.msk.bf16.mxu1 %vm343_vm0, %v2512_v46 }
 0x1bf   : > { %2296 = vmatmul.mubr.msk.bf16.gmra.mrb[4].mxu1 %vm343_vm0, %v2513_v47 }
 0x28a   : > { %v2293_v42 = vpop.f32.mrb[0].mxu1 }
 0x28b   : > { %v681_v43 = vpop.f32.mrb[1].mxu1  ;;  %v690_v44 = vadd.f32 %v2293_v42, %v593_v40 }
 0x28c   : > { %v682_v45 = vadd.f32 %v681_v43, %v585_v52  ;;  %v2294_v50 = vpop.f32.mrb[2].mxu1 }
 0x28d   : > { %v684_v54 = vpop.f32.mrb[3].mxu1  ;;  %v693_v56 = vadd.f32 %v2294_v50, %v597_v41  ;;  %v3096_v59 = vadd.f32 %v690_v44, %v2975_v3 }
 0x28e   : > { %v3093_v55 = vadd.f32 %v682_v45, %v2971_v1  ;;  %v685_v57 = vadd.f32 %v684_v54, %v589_v51 }
 0x28f   : > { %v3104_v62 = vadd.f32 %v693_v56, %v2977_v4  ;;  %v723_v3 = vsel %vm343_vm0, %v3096_v59, 0.0 }
 0x290   : > { %v3099_v60 = vadd.f32 %v685_v57, %v2973_v2  ;;  %v720_v61 = vsel %vm343_vm0, %v3093_v55, 0.0 }
 0x291   : > { %v725_v4 = vsel %vm343_vm0, %v3104_v62, 0.0 }
 0x292   : > { %v721_v63 = vsel %vm343_vm0, %v3099_v60, 0.0  ;;  %v2297_v1 = vpop.f32.mrb[4].mxu1 }
 0x293   : > { %v722_v6 = vadd.f32 %v721_v63, %v720_v61  ;;  %v697_v7 = vpop.f32.mrb[5].mxu1  ;;  %v706_v9 = vadd.f32 %v2297_v1, %v609_v5 }
 0x294   : > { %v698_v10 = vadd.f32 %v697_v7, %v601_v53  ;;  %v2298_v2 = vpop.f32.mrb[6].mxu1 }
 0x295   : > { %v724_v13 = vadd.f32 %v723_v3, %v722_v6  ;;  %v700_v15 = vpop.f32.mrb[7].mxu1  ;;  %v709_v18 = vadd.f32 %v2298_v2, %v613_v11  ;;  %v3116_v23 = vadd.f32 %v706_v9, %v2992_v14 }
 0x296   : > { %v3113_v17 = vadd.f32 %v698_v10, %v2985_v8  ;;  %v701_v21 = vadd.f32 %v700_v15, %v605_v58 }
 0x297   : > { %v726_v22 = vadd.f32 %v725_v4, %v724_v13  ;;  %v3124_v33 = vadd.f32 %v709_v18, %v2996_v16  ;;  %v731_v35 = vsel %vm343_vm0, %v3116_v23, 0.0 }
 0x298   : > { %v727_v26 = vsel %vm343_vm0, %v3113_v17, 0.0  ;;  %v3121_v29 = vadd.f32 %v701_v21, %v2989_v12 }
 0x299   : > { %v728_v30 = vadd.f32 %v727_v26, %v726_v22  ;;  %v733_v14 = vsel %vm343_vm0, %v3124_v33, 0.0 }
 0x29a   : > { %v729_v8 = vsel %vm343_vm0, %v3121_v29, 0.0 }
 0x29b   : > { %v730_v34 = vadd.f32 %v729_v8, %v728_v30 }
 0x29d   : > { %v732_v36 = vadd.f32 %v731_v35, %v730_v34 }
 0x29f   : > { %v734_v37 = vadd.f32 %v733_v14, %v732_v36 }
 0x2a1   : > { %v735_v38 = vrot.slane %v734_v37, 4 }
 0x2a3   : > { %v736_v39 = vadd.f32 %v735_v38, %v734_v37 }
 0x2a5   : > { %v737_v12 = vrot.slane %v736_v39, 2 }
 0x2a7   : > { %v738_v46 = vadd.f32 %v737_v12, %v736_v39 }
 0x2a9   : > { %v739_v47 = vrot.slane %v738_v46, 1 }
 0x2ab   : > { %v740_v48 = vadd.f32 %v739_v47, %v738_v46 }
 0x2ad   : > { %v741_v16 = vmul.f32 0.015625, %v740_v48 }
 0x2af   : > { %v742_v49 = vsub.f32 %v3093_v55, %v741_v16  ;;  %v743_v51 = vsub.f32 %v3099_v60, %v741_v16  ;;  %v744_v52 = vsub.f32 %v3096_v59, %v741_v16  ;;  %v745_v40 = vsub.f32 %v3104_v62, %v741_v16 }
 0x2b0   : > { %v746_v41 = vsub.f32 %v3113_v17, %v741_v16  ;;  %v747_v45 = vsub.f32 %v3121_v29, %v741_v16  ;;  %v748_v57 = vsub.f32 %v3116_v23, %v741_v16  ;;  %v749_v5 = vsub.f32 %v3124_v33, %v741_v16 }
 0x2b1   : > { %v750_v42 = vmul.f32 %v742_v49, %v742_v49  ;;  %v751_v43 = vmul.f32 %v743_v51, %v743_v51  ;;  %v752_v44 = vmul.f32 %v744_v52, %v744_v52  ;;  %v753_v50 = vmul.f32 %v745_v40, %v745_v40 }
 0x2b2   : > { %v754_v58 = vmul.f32 %v746_v41, %v746_v41  ;;  %v755_v1 = vmul.f32 %v747_v45, %v747_v45  ;;  %v756_v3 = vmul.f32 %v748_v57, %v748_v57  ;;  %v757_v11 = vmul.f32 %v749_v5, %v749_v5 }
 0x2b3   : > { %v758_v53 = vsel %vm343_vm0, %v750_v42, 0.0  ;;  %v759_v54 = vsel %vm343_vm0, %v751_v43, 0.0  ;;  %v761_v61 = vsel %vm343_vm0, %v752_v44, 0.0  ;;  %v763_v6 = vsel %vm343_vm0, %v753_v50, 0.0 }
 0x2b4   : > { %v760_v56 = vadd.f32 %v759_v54, %v758_v53  ;;  %v765_v9 = vsel %vm343_vm0, %v754_v58, 0.0  ;;  %v767_v2 = vsel %vm343_vm0, %v755_v1, 0.0  ;;  %v769_v15 = vsel %vm343_vm0, %v756_v3, 0.0  ;;  %v2515_v54 = vld [vmem:[#allocation5 + $0x28] sm:$0xff]  }
 0x2b5   : > { %v771_v18 = vsel %vm343_vm0, %v757_v11, 0.0 }
 0x2b6   : > { %v762_v63 = vadd.f32 %v761_v61, %v760_v56  ;;  %v809_v56 = vpop.permute.xlu0 %808 }
 0x2b8   : > { %v764_v7 = vadd.f32 %v763_v6, %v762_v63 }
 0x2ba   : > { %v766_v10 = vadd.f32 %v765_v9, %v764_v7  ;;  %v821_v1 = vpop.permute.xlu0 %820 }
 0x2bc   : > { %v768_v13 = vadd.f32 %v767_v2, %v766_v10 }
 0x2be   : > { %v770_v4 = vadd.f32 %v769_v15, %v768_v13 }
 0x2c0   : > { %v772_v21 = vadd.f32 %v771_v18, %v770_v4  ;;  %v829_v18 = vpop.permute.xlu0 %828 }
 0x2c2   : > { %v773_v22 = vrot.slane %v772_v21, 4 }
 0x2c4   : > { %v774_v26 = vadd.f32 %v773_v22, %v772_v21 }
 0x2c6   : > { %v775_v30 = vrot.slane %v774_v26, 2 }
 0x2c8   : > { %v776_v8 = vadd.f32 %v775_v30, %v774_v26 }
 0x2ca   : > { %v777_v34 = vrot.slane %v776_v8, 1 }
 0x2cc   : > { %v778_v35 = vadd.f32 %v777_v34, %v776_v8 }
 0x2ce   : > { %v779_v36 = vmul.f32 0.015625, %v778_v35 }
 0x2d0   : > { %v780_v14 = vadd.f32 1e-05, %v779_v36 }
 0x2d2   : > { %2553 = vrsqrt.f32 %v780_v14 }
 0x2dc   : > { %v2554_v37 = vpop.eup %2553 }
 0x2dd   : > { %v782_v38 = vmul.f32 %v2554_v37, %v742_v49  ;;  %v783_v39 = vmul.f32 %v2554_v37, %v743_v51  ;;  %v784_v12 = vmul.f32 %v2554_v37, %v744_v52  ;;  %v785_v46 = vmul.f32 %v2554_v37, %v745_v40  ;;  %v2516_v49 = vld [vmem:[#allocation5 + $0x30] sm:$0xff]   ;;  %v2517_v51 = vld [vmem:[#allocation5 + $0x38] sm:$0xff]   ;;  %v2518_v52 = vld [vmem:[#allocation7 + $0x20] sm:$0xff]  }
 0x2de   : > { %v786_v16 = vmul.f32 %v2554_v37, %v746_v41  ;;  %v787_v42 = vmul.f32 %v2554_v37, %v747_v45  ;;  %v788_v44 = vmul.f32 %v2554_v37, %v748_v57  ;;  %v789_v50 = vmul.f32 %v2554_v37, %v749_v5  ;;  %2323 = vmatprep.mubr.msk.bf16.mxu1 %vm343_vm0, %v2518_v52  ;;  %v805_v41 = vpop.permute.xlu1 %804 }
 0x2df   : > { %v799_v47 = vpack.c.bf16 %v783_v39, %v782_v38  ;;  %v800_v48 = vpack.c.bf16 %v785_v46, %v784_v12  ;;  %v2737_v40 = vmov 5  }
 0x2e0   : > { %v801_v43 = vpack.c.bf16 %v787_v42, %v786_v16  ;;  %v802_v53 = vpack.c.bf16 %v789_v50, %v788_v44  ;;  %2497 = vset.pattern.permute.xlu1 %v2737_v40  ;;  %2496 = vset.pattern.permute.xlu0 %v2737_v40  ;;  %v2519_v16 = vld [vmem:[#allocation7 + $0x28] sm:$0xff]   ;;  %v2520_v42 = vld [vmem:[#allocation7 + $0x30] sm:$0xff]   ;;  %v2522_v44 = vld [vmem:[#allocation5 + $0x40] sm:$0xff]   ;;  %v2738_v50 = vmov 2  }
 0x2e1   : > { %2299 = vmatprep.subr.bf16.mxu0 %v799_v47  ;;  %958 = vperm.xlu1 %2497, %v3019_v24  }
 0x2e2   : > { %2300 = vmatpush3.bf16.msra.mxu0 %v799_v47  ;;  %954 = vperm.xlu0 %2496, %v3003_v19   ;;  %v813_v45 = vpop.permute.xlu1 %812 }
 0x2e3   : > { %2301 = vmatprep.subr.bf16.mxu0 %v800_v48 }
 0x2e5   : > { %962 = vperm.xlu1 %2497, %v3008_v20  }
 0x2e6   : > { %2302 = vmatpush3.bf16.msra.mxu0 %v800_v48  ;;  %966 = vperm.xlu0 %2496, %v3024_v25   ;;  %v817_v57 = vpop.permute.xlu1 %816 }
 0x2e7   : > { %2303 = vmatprep.subr.bf16.mxu0 %v801_v43 }
 0x2e9   : > { %970 = vperm.xlu1 %2497, %v3029_v27  }
 0x2ea   : > { %2304 = vmatpush3.bf16.msra.mxu0 %v801_v43  ;;  %974 = vperm.xlu0 %2496, %v3034_v28   ;;  %v825_v9 = vpop.permute.xlu1 %824  ;;  %v2521_v43 = vld [vmem:[#allocation7 + $0x38] sm:$0xff]  }
 0x2eb   : > { %2305 = vmatprep.subr.bf16.mxu0 %v802_v53 }
 0x2ed   : > { %978 = vperm.xlu1 %2497, %v3041_v31  }
 0x2ee   : > { %2306 = vmatpush3.bf16.msra.mxu0 %v802_v53  ;;  %982 = vperm.xlu0 %2496, %v3046_v32   ;;  %v833_v8 = vpop.permute.xlu1 %832 }
 0x2f1   : > { %2308 = vmatmul.mubr.msk.bf16.vlgmr.msra.gmra.mrb[8].mxu0 %vm343_vm0, %v2515_v54  ;;  %2498 = vset.pattern.permute.xlu1 %v2738_v50 }
 0x2f2   : > { %2311 = vmatprep.mubr.msk.bf16.mxu0 %vm343_vm0, %v2516_v49  ;;  %2499 = vset.pattern.permute.xlu0 %v2738_v50 }
 0x2f3   : > { %1174 = vperm.xlu1 %2498, %v3003_v19   ;;  %1178 = vperm.xlu0 %2499, %v3019_v24  }
 0x2f7   : > { %1182 = vperm.xlu1 %2498, %v3008_v20   ;;  %1190 = vperm.xlu0 %2499, %v3029_v27  }
 0x2f9   : > { %2312 = vmatmul.mubr.msk.bf16.gmra.mrb[12].mxu0 %vm343_vm0, %v2517_v51 }
 0x2fa   : > { %2339 = vmatprep.mubr.msk.bf16.mxu0 %vm343_vm0, %v2522_v44 }
 0x2fb   : > { %1186 = vperm.xlu1 %2498, %v3024_v25   ;;  %1198 = vperm.xlu0 %2499, %v3041_v31  }
 0x2ff   : > { %1194 = vperm.xlu1 %2498, %v3034_v28  }
 0x303   : > { %1202 = vperm.xlu1 %2498, %v3046_v32  }
 0x360   : > { %v959_v53 = vpop.permute.xlu1 %958 }
 0x361   : > { %v955_v54 = vpop.permute.xlu0 %954 }
 0x364   : > { %v963_v49 = vpop.permute.xlu1 %962 }
 0x365   : > { %v967_v51 = vpop.permute.xlu0 %966 }
 0x368   : > { %v971_v20 = vpop.permute.xlu1 %970 }
 0x3c4   : > { %v2309_v58 = vpop.f32.mrb[8].mxu0 }
 0x3c5   : > { %v910_v61 = vadd.f32 %v2309_v58, %v813_v45  ;;  %v901_v63 = vpop.f32.mrb[9].mxu0 }
 0x3c6   : > { %v902_v5 = vadd.f32 %v901_v63, %v805_v41  ;;  %v2310_v6 = vpop.f32.mrb[10].mxu0  ;;  %v979_v63 = vpop.permute.xlu1 %978 }
 0x3c7   : > { %v913_v7 = vadd.f32 %v2310_v6, %v817_v57  ;;  %v904_v3 = vpop.f32.mrb[11].mxu0  ;;  %v934_v2 = vmax.f32 %v910_v61, 0.0  ;;  %v975_v57 = vpop.permute.xlu0 %974 }
 0x3c8   : > { %v905_v10 = vadd.f32 %v904_v3, %v809_v56  ;;  %v932_v13 = vmax.f32 %v902_v5, 0.0 }
 0x3c9   : > { %v935_v11 = vmax.f32 %v913_v7, 0.0 }
 0x3ca   : > { %v933_v15 = vmax.f32 %v905_v10, 0.0 }
 0x3cb   : > { %v950_v4 = vpack.c.bf16 %v935_v11, %v934_v2  ;;  %v983_v3 = vpop.permute.xlu0 %982 }
 0x3cc   : > { %v949_v21 = vpack.c.bf16 %v933_v15, %v932_v13  ;;  %v2313_v22 = vpop.f32.mrb[12].mxu0 }
 0x3cd   : > { %v926_v26 = vadd.f32 %v2313_v22, %v829_v18  ;;  %v917_v30 = vpop.f32.mrb[13].mxu0 }
 0x3ce   : > { %v918_v34 = vadd.f32 %v917_v30, %v821_v1  ;;  %v2314_v35 = vpop.f32.mrb[14].mxu0  ;;  %2315 = vmatprep.subr.bf16.mxu1 %v949_v21 }
 0x3cf   : > { %v929_v36 = vadd.f32 %v2314_v35, %v833_v8  ;;  %v920_v14 = vpop.f32.mrb[15].mxu0  ;;  %2316 = vmatpush3.bf16.msra.mxu1 %v949_v21  ;;  %v938_v38 = vmax.f32 %v926_v26, 0.0 }
 0x3d0   : > { %v921_v37 = vadd.f32 %v920_v14, %v825_v9  ;;  %2317 = vmatprep.subr.bf16.mxu1 %v950_v4  ;;  %v936_v12 = vmax.f32 %v918_v34, 0.0 }
 0x3d1   : > { %v939_v39 = vmax.f32 %v929_v36, 0.0 }
 0x3d2   : > { %v937_v46 = vmax.f32 %v921_v37, 0.0 }
 0x3d3   : > { %v952_v47 = vpack.c.bf16 %v939_v39, %v938_v38  ;;  %2318 = vmatpush3.bf16.msra.mxu1 %v950_v4 }
 0x3d4   : > { %v951_v48 = vpack.c.bf16 %v937_v46, %v936_v12 }
 0x3d6   : > { %2319 = vmatprep.subr.bf16.mxu1 %v951_v48 }
 0x3d7   : > { %2320 = vmatpush3.bf16.msra.mxu1 %v951_v48 }
 0x3d8   : > { %2321 = vmatprep.subr.bf16.mxu1 %v952_v47 }
 0x3db   : > { %2322 = vmatpush3.bf16.msra.mxu1 %v952_v47 }
 0x3de   : > { %2324 = vmatmul.mubr.msk.bf16.vlgmr.msra.gmra.mrb[8].mxu1 %vm343_vm0, %v2519_v16 }
 0x3df   : > { %2327 = vmatprep.mubr.msk.bf16.mxu1 %vm343_vm0, %v2520_v42 }
 0x3e6   : > { %2328 = vmatmul.mubr.msk.bf16.gmra.mrb[12].mxu1 %vm343_vm0, %v2521_v43 }
 0x4b1   : > { %v2325_v52 = vpop.f32.mrb[8].mxu1 }
 0x4b2   : > { %v1051_v40 = vpop.f32.mrb[9].mxu1  ;;  %v1060_v19 = vadd.f32 %v2325_v52, %v963_v49 }
 0x4b3   : > { %v1052_v24 = vadd.f32 %v1051_v40, %v955_v54  ;;  %v2326_v41 = vpop.f32.mrb[10].mxu1 }
 0x4b4   : > { %v1054_v45 = vpop.f32.mrb[11].mxu1  ;;  %v1063_v56 = vadd.f32 %v2326_v41, %v967_v51  ;;  %v3176_v31 = vadd.f32 %v1060_v19, %v3096_v59 }
 0x4b5   : > { %v3173_v27 = vadd.f32 %v1052_v24, %v3093_v55  ;;  %v1055_v25 = vadd.f32 %v1054_v45, %v959_v53 }
 0x4b6   : > { %v3184_v58 = vadd.f32 %v1063_v56, %v3104_v62  ;;  %v1093_v59 = vsel %vm343_vm0, %v3176_v31, 0.0 }
 0x4b7   : > { %v3179_v28 = vadd.f32 %v1055_v25, %v3099_v60  ;;  %v1090_v32 = vsel %vm343_vm0, %v3173_v27, 0.0 }
 0x4b8   : > { %v1095_v62 = vsel %vm343_vm0, %v3184_v58, 0.0 }
 0x4b9   : > { %v1091_v61 = vsel %vm343_vm0, %v3179_v28, 0.0  ;;  %v2329_v55 = vpop.f32.mrb[12].mxu1 }
 0x4ba   : > { %v1092_v1 = vadd.f32 %v1091_v61, %v1090_v32  ;;  %v1067_v5 = vpop.f32.mrb[13].mxu1  ;;  %v1076_v6 = vadd.f32 %v2329_v55, %v979_v63 }
 0x4bb   : > { %v1068_v7 = vadd.f32 %v1067_v5, %v971_v20  ;;  %v2330_v60 = vpop.f32.mrb[14].mxu1 }
 0x4bc   : > { %v1094_v9 = vadd.f32 %v1093_v59, %v1092_v1  ;;  %v1070_v10 = vpop.f32.mrb[15].mxu1  ;;  %v1079_v11 = vadd.f32 %v2330_v60, %v983_v3  ;;  %v3196_v4 = vadd.f32 %v1076_v6, %v3116_v23 }
 0x4bd   : > { %v3193_v2 = vadd.f32 %v1068_v7, %v3113_v17  ;;  %v1071_v13 = vadd.f32 %v1070_v10, %v975_v57 }
 0x4be   : > { %v1096_v15 = vadd.f32 %v1095_v62, %v1094_v9  ;;  %v3204_v26 = vadd.f32 %v1079_v11, %v3124_v33  ;;  %v1101_v8 = vsel %vm343_vm0, %v3196_v4, 0.0 }
 0x4bf   : > { %v1097_v18 = vsel %vm343_vm0, %v3193_v2, 0.0  ;;  %v3201_v21 = vadd.f32 %v1071_v13, %v3121_v29 }
 0x4c0   : > { %v1098_v22 = vadd.f32 %v1097_v18, %v1096_v15  ;;  %v1103_v23 = vsel %vm343_vm0, %v3204_v26, 0.0 }
 0x4c1   : > { %v1099_v17 = vsel %vm343_vm0, %v3201_v21, 0.0 }
 0x4c2   : > { %v1100_v30 = vadd.f32 %v1099_v17, %v1098_v22 }
 0x4c4   : > { %v1102_v34 = vadd.f32 %v1101_v8, %v1100_v30 }
 0x4c6   : > { %v1104_v35 = vadd.f32 %v1103_v23, %v1102_v34 }
 0x4c8   : > { %v1105_v36 = vrot.slane %v1104_v35, 4 }
 0x4ca   : > { %v1106_v14 = vadd.f32 %v1105_v36, %v1104_v35 }
 0x4cc   : > { %v1107_v29 = vrot.slane %v1106_v14, 2 }
 0x4ce   : > { %v1108_v37 = vadd.f32 %v1107_v29, %v1106_v14 }
 0x4d0   : > { %v1109_v38 = vrot.slane %v1108_v37, 1 }
 0x4d2   : > { %v1110_v39 = vadd.f32 %v1109_v38, %v1108_v37  ;;  %v2523_v38 = vld [vmem:[#allocation5 + $0x48] sm:$0xff]  }
 0x4d4   : > { %v1111_v33 = vmul.f32 0.015625, %v1110_v39  ;;  %v2524_v39 = vld [vmem:[#allocation5 + $0x50] sm:$0xff]  }
 0x4d6   : > { %v1112_v12 = vsub.f32 %v3173_v27, %v1111_v33  ;;  %v1113_v46 = vsub.f32 %v3179_v28, %v1111_v33  ;;  %v1114_v47 = vsub.f32 %v3176_v31, %v1111_v33  ;;  %v1115_v48 = vsub.f32 %v3184_v58, %v1111_v33 }
 0x4d7   : > { %v1116_v16 = vsub.f32 %v3193_v2, %v1111_v33  ;;  %v1117_v50 = vsub.f32 %v3201_v21, %v1111_v33  ;;  %v1118_v52 = vsub.f32 %v3196_v4, %v1111_v33  ;;  %v1119_v20 = vsub.f32 %v3204_v26, %v1111_v33  ;;  %v2525_v33 = vld [vmem:[#allocation5 + $0x58] sm:$0xff]  }
 0x4d8   : > { %v1120_v42 = vmul.f32 %v1112_v12, %v1112_v12  ;;  %v1121_v43 = vmul.f32 %v1113_v46, %v1113_v46  ;;  %v1122_v44 = vmul.f32 %v1114_v47, %v1114_v47  ;;  %v1123_v53 = vmul.f32 %v1115_v48, %v1115_v48 }
 0x4d9   : > { %v1124_v40 = vmul.f32 %v1116_v16, %v1116_v16  ;;  %v1125_v41 = vmul.f32 %v1117_v50, %v1117_v50  ;;  %v1126_v25 = vmul.f32 %v1118_v52, %v1118_v52  ;;  %v1127_v55 = vmul.f32 %v1119_v20, %v1119_v20 }
 0x4da   : > { %v1128_v54 = vsel %vm343_vm0, %v1120_v42, 0.0  ;;  %v1129_v49 = vsel %vm343_vm0, %v1121_v43, 0.0  ;;  %v1131_v19 = vsel %vm343_vm0, %v1122_v44, 0.0  ;;  %v1133_v45 = vsel %vm343_vm0, %v1123_v53, 0.0  ;;  %v3253_v42 = vld [vmem:[%s3454_s1 + $0x18] sm:$0xff]  ;;  %v3259_v43 = vld [vmem:[%s3454_s1 + $0x20] sm:$0xff] }
 0x4db   : > { %v1130_v51 = vadd.f32 %v1129_v49, %v1128_v54  ;;  %v1135_v57 = vsel %vm343_vm0, %v1124_v40, 0.0  ;;  %v1137_v61 = vsel %vm343_vm0, %v1125_v41, 0.0  ;;  %v1139_v1 = vsel %vm343_vm0, %v1126_v25, 0.0  ;;  %v3265_v44 = vld [vmem:[%s3454_s1 + $0x28] sm:$0xff]  ;;  %v3277_v53 = vld [vmem:[%s3454_s1 + $0x38] sm:$0xff]  ;;  %v1175_v54 = vpop.permute.xlu1 %1174 }
 0x4dc   : > { %v1141_v59 = vsel %vm343_vm0, %v1127_v55, 0.0 }
 0x4dd   : > { %v1132_v24 = vadd.f32 %v1131_v19, %v1130_v51  ;;  %v1179_v51 = vpop.permute.xlu0 %1178 }
 0x4df   : > { %v1134_v56 = vadd.f32 %v1133_v45, %v1132_v24  ;;  %v1183_v49 = vpop.permute.xlu1 %1182 }
 0x4e1   : > { %v1136_v32 = vadd.f32 %v1135_v57, %v1134_v56  ;;  %v1191_v41 = vpop.permute.xlu0 %1190 }
 0x4e3   : > { %v1138_v63 = vadd.f32 %v1137_v61, %v1136_v32 }
 0x4e5   : > { %v1140_v5 = vadd.f32 %v1139_v1, %v1138_v63 }
 0x4e7   : > { %v1142_v6 = vadd.f32 %v1141_v59, %v1140_v5  ;;  %v1199_v59 = vpop.permute.xlu0 %1198 }
 0x4e9   : > { %v1143_v7 = vrot.slane %v1142_v6, 4 }
 0x4eb   : > { %v1144_v60 = vadd.f32 %v1143_v7, %v1142_v6 }
 0x4ed   : > { %v1145_v3 = vrot.slane %v1144_v60, 2 }
 0x4ef   : > { %v1146_v9 = vadd.f32 %v1145_v3, %v1144_v60 }
 0x4f1   : > { %v1147_v10 = vrot.slane %v1146_v9, 1 }
 0x4f3   : > { %v1148_v62 = vadd.f32 %v1147_v10, %v1146_v9 }
 0x4f5   : > { %v1149_v11 = vmul.f32 0.015625, %v1148_v62 }
 0x4f7   : > { %v1150_v13 = vadd.f32 1e-05, %v1149_v11 }
 0x4f9   : > { %2555 = vrsqrt.f32 %v1150_v13 }
 0x503   : > { %v2556_v15 = vpop.eup %2555 }
 0x504   : > { %v1152_v18 = vmul.f32 %v2556_v15, %v1112_v12  ;;  %v1153_v22 = vmul.f32 %v2556_v15, %v1113_v46  ;;  %v1154_v17 = vmul.f32 %v2556_v15, %v1114_v47  ;;  %v1155_v30 = vmul.f32 %v2556_v15, %v1115_v48  ;;  %v2526_v12 = vld [vmem:[#allocation7 + $0x40] sm:$0xff]   ;;  %v3235_v47 = vld [vmem:[%s3454_s1 + $0x8] sm:$0xff] }
 0x505   : > { %v1156_v23 = vmul.f32 %v2556_v15, %v1116_v16  ;;  %v1157_v35 = vmul.f32 %v2556_v15, %v1117_v50  ;;  %v1158_v14 = vmul.f32 %v2556_v15, %v1118_v52  ;;  %v1159_v29 = vmul.f32 %v2556_v15, %v1119_v20  ;;  %2355 = vmatprep.mubr.msk.bf16.mxu1 %vm343_vm0, %v2526_v12  ;;  %v3241_v48 = vld [vmem:[%s3454_s1] sm:$0xff]  ;;  %v3247_v16 = vld [vmem:[%s3454_s1 + $0x10] sm:$0xff]  ;;  %v1187_v52 = vpop.permute.xlu1 %1186 }
 0x506   : > { %v1169_v8 = vpack.c.bf16 %v1153_v22, %v1152_v18  ;;  %v1170_v34 = vpack.c.bf16 %v1155_v30, %v1154_v17  ;;  %v2739_v46 = vmov 6   ;;  %v3271_v50 = vld [vmem:[%s3454_s1 + $0x30] sm:$0xff] }
 0x507   : > { %v1171_v36 = vpack.c.bf16 %v1157_v35, %v1156_v23  ;;  %v1172_v37 = vpack.c.bf16 %v1159_v29, %v1158_v14  ;;  %2501 = vset.pattern.permute.xlu1 %v2739_v46  ;;  %2500 = vset.pattern.permute.xlu0 %v2739_v46  ;;  %v2527_v23 = vld [vmem:[#allocation7 + $0x48] sm:$0xff]   ;;  %v2528_v35 = vld [vmem:[#allocation7 + $0x50] sm:$0xff]   ;;  %v2530_v14 = vld [vmem:[#allocation5 + $0x60] sm:$0xff]   ;;  %v2740_v29 = vmov 3  }
 0x508   : > { %2331 = vmatprep.subr.bf16.mxu0 %v1169_v8  ;;  %1328 = vperm.xlu1 %2501, %v3235_v47  }
 0x509   : > { %2332 = vmatpush3.bf16.msra.mxu0 %v1169_v8  ;;  %1324 = vperm.xlu0 %2500, %v3241_v48   ;;  %v1195_v57 = vpop.permute.xlu1 %1194 }
 0x50a   : > { %2333 = vmatprep.subr.bf16.mxu0 %v1170_v34 }
 0x50c   : > { %1332 = vperm.xlu1 %2501, %v3247_v16  }
 0x50d   : > { %2334 = vmatpush3.bf16.msra.mxu0 %v1170_v34  ;;  %1336 = vperm.xlu0 %2500, %v3253_v42   ;;  %v1203_v9 = vpop.permute.xlu1 %1202 }
 0x50e   : > { %2335 = vmatprep.subr.bf16.mxu0 %v1171_v36 }
 0x510   : > { %1340 = vperm.xlu1 %2501, %v3259_v43  }
 0x511   : > { %2336 = vmatpush3.bf16.msra.mxu0 %v1171_v36  ;;  %1344 = vperm.xlu0 %2500, %v3265_v44   ;;  %v2529_v36 = vld [vmem:[#allocation7 + $0x58] sm:$0xff]  }
 0x512   : > { %2337 = vmatprep.subr.bf16.mxu0 %v1172_v37 }
 0x514   : > { %1348 = vperm.xlu1 %2501, %v3271_v50  }
 0x515   : > { %2338 = vmatpush3.bf16.msra.mxu0 %v1172_v37  ;;  %1352 = vperm.xlu0 %2500, %v3277_v53  }
 0x518   : > { %2340 = vmatmul.mubr.msk.bf16.vlgmr.msra.gmra.mrb[16].mxu0 %vm343_vm0, %v2523_v38  ;;  %2502 = vset.pattern.permute.xlu1 %v2740_v29 }
 0x519   : > { %2343 = vmatprep.mubr.msk.bf16.mxu0 %vm343_vm0, %v2524_v39  ;;  %2503 = vset.pattern.permute.xlu0 %v2740_v29 }
 0x51a   : > { %1544 = vperm.xlu1 %2502, %v3241_v48   ;;  %1548 = vperm.xlu0 %2503, %v3235_v47  }
 0x51e   : > { %1552 = vperm.xlu1 %2502, %v3247_v16   ;;  %1560 = vperm.xlu0 %2503, %v3259_v43  }
 0x520   : > { %2344 = vmatmul.mubr.msk.bf16.gmra.mrb[20].mxu0 %vm343_vm0, %v2525_v33 }
 0x521   : > { %2371 = vmatprep.mubr.msk.bf16.mxu0 %vm343_vm0, %v2530_v14 }
 0x522   : > { %1556 = vperm.xlu1 %2502, %v3253_v42   ;;  %1568 = vperm.xlu0 %2503, %v3271_v50  }
 0x526   : > { %1564 = vperm.xlu1 %2502, %v3265_v44  }
 0x52a   : > { %1572 = vperm.xlu1 %2502, %v3277_v53  }
 0x587   : > { %v1329_v37 = vpop.permute.xlu1 %1328 }
 0x588   : > { %v1325_v38 = vpop.permute.xlu0 %1324 }
 0x58b   : > { %v1333_v39 = vpop.permute.xlu1 %1332 }
 0x58c   : > { %v1337_v33 = vpop.permute.xlu0 %1336 }
 0x5eb   : > { %v2341_v40 = vpop.f32.mrb[16].mxu0 }
 0x5ec   : > { %v1280_v19 = vadd.f32 %v2341_v40, %v1183_v49  ;;  %v1271_v24 = vpop.f32.mrb[17].mxu0 }
 0x5ed   : > { %v1272_v20 = vadd.f32 %v1271_v24, %v1175_v54  ;;  %v2342_v45 = vpop.f32.mrb[18].mxu0 }
 0x5ee   : > { %v1283_v56 = vadd.f32 %v2342_v45, %v1187_v52  ;;  %v1274_v25 = vpop.f32.mrb[19].mxu0  ;;  %v1304_v61 = vmax.f32 %v1280_v19, 0.0  ;;  %v1341_v52 = vpop.permute.xlu1 %1340 }
 0x5ef   : > { %v1275_v32 = vadd.f32 %v1274_v25, %v1179_v51  ;;  %v1302_v63 = vmax.f32 %v1272_v20, 0.0  ;;  %v1345_v20 = vpop.permute.xlu0 %1344 }
 0x5f0   : > { %v1305_v55 = vmax.f32 %v1283_v56, 0.0 }
 0x5f1   : > { %v1303_v1 = vmax.f32 %v1275_v32, 0.0 }
 0x5f2   : > { %v1320_v5 = vpack.c.bf16 %v1305_v55, %v1304_v61  ;;  %v1349_v61 = vpop.permute.xlu1 %1348 }
 0x5f3   : > { %v1319_v6 = vpack.c.bf16 %v1303_v1, %v1302_v63  ;;  %v2345_v7 = vpop.f32.mrb[20].mxu0 }
 0x5f4   : > { %v1296_v60 = vadd.f32 %v2345_v7, %v1199_v59  ;;  %v1287_v3 = vpop.f32.mrb[21].mxu0  ;;  %v1353_v59 = vpop.permute.xlu0 %1352 }
 0x5f5   : > { %v1288_v10 = vadd.f32 %v1287_v3, %v1191_v41  ;;  %v2346_v62 = vpop.f32.mrb[22].mxu0  ;;  %2347 = vmatprep.subr.bf16.mxu1 %v1319_v6 }
 0x5f6   : > { %v1299_v11 = vadd.f32 %v2346_v62, %v1203_v9  ;;  %v1290_v13 = vpop.f32.mrb[23].mxu0  ;;  %2348 = vmatpush3.bf16.msra.mxu1 %v1319_v6  ;;  %v1308_v18 = vmax.f32 %v1296_v60, 0.0 }
 0x5f7   : > { %v1291_v15 = vadd.f32 %v1290_v13, %v1195_v57  ;;  %2349 = vmatprep.subr.bf16.mxu1 %v1320_v5  ;;  %v1306_v17 = vmax.f32 %v1288_v10, 0.0 }
 0x5f8   : > { %v1309_v22 = vmax.f32 %v1299_v11, 0.0 }
 0x5f9   : > { %v1307_v30 = vmax.f32 %v1291_v15, 0.0 }
 0x5fa   : > { %v1322_v8 = vpack.c.bf16 %v1309_v22, %v1308_v18  ;;  %2350 = vmatpush3.bf16.msra.mxu1 %v1320_v5 }
 0x5fb   : > { %v1321_v34 = vpack.c.bf16 %v1307_v30, %v1306_v17 }
 0x5fd   : > { %2351 = vmatprep.subr.bf16.mxu1 %v1321_v34 }
 0x5fe   : > { %2352 = vmatpush3.bf16.msra.mxu1 %v1321_v34 }
 0x5ff   : > { %2353 = vmatprep.subr.bf16.mxu1 %v1322_v8 }
 0x602   : > { %2354 = vmatpush3.bf16.msra.mxu1 %v1322_v8 }
 0x605   : > { %2356 = vmatmul.mubr.msk.bf16.vlgmr.msra.gmra.mrb[16].mxu1 %vm343_vm0, %v2527_v23 }
 0x606   : > { %2359 = vmatprep.mubr.msk.bf16.mxu1 %vm343_vm0, %v2528_v35 }
 0x60d   : > { %2360 = vmatmul.mubr.msk.bf16.gmra.mrb[20].mxu1 %vm343_vm0, %v2529_v36 }
 0x6d8   : > { %v2357_v12 = vpop.f32.mrb[16].mxu1 }
 0x6d9   : > { %v1421_v46 = vpop.f32.mrb[17].mxu1  ;;  %v1430_v54 = vadd.f32 %v2357_v12, %v1333_v39 }
 0x6da   : > { %v1422_v49 = vadd.f32 %v1421_v46, %v1325_v38  ;;  %v2358_v51 = vpop.f32.mrb[18].mxu1 }
 0x6db   : > { %v1424_v40 = vpop.f32.mrb[19].mxu1  ;;  %v1433_v24 = vadd.f32 %v2358_v51, %v1337_v33  ;;  %v3296_v45 = vadd.f32 %v1430_v54, %v3176_v31 }
 0x6dc   : > { %v3293_v19 = vadd.f32 %v1422_v49, %v3173_v27  ;;  %v1425_v41 = vadd.f32 %v1424_v40, %v1329_v37 }
 0x6dd   : > { %v3304_v57 = vadd.f32 %v1433_v24, %v3184_v58  ;;  %v1463_v31 = vsel %vm343_vm0, %v3296_v45, 0.0 }
 0x6de   : > { %v3299_v56 = vadd.f32 %v1425_v41, %v3179_v28  ;;  %v1460_v25 = vsel %vm343_vm0, %v3293_v19, 0.0 }
 0x6df   : > { %v1465_v58 = vsel %vm343_vm0, %v3304_v57, 0.0 }
 0x6e0   : > { %v1461_v32 = vsel %vm343_vm0, %v3299_v56, 0.0  ;;  %v2361_v27 = vpop.f32.mrb[20].mxu1 }
 0x6e1   : > { %v1462_v55 = vadd.f32 %v1461_v32, %v1460_v25  ;;  %v1437_v63 = vpop.f32.mrb[21].mxu1  ;;  %v1446_v1 = vadd.f32 %v2361_v27, %v1349_v61 }
 0x6e2   : > { %v1438_v5 = vadd.f32 %v1437_v63, %v1341_v52  ;;  %v2362_v28 = vpop.f32.mrb[22].mxu1 }
 0x6e3   : > { %v1464_v6 = vadd.f32 %v1463_v31, %v1462_v55  ;;  %v1440_v7 = vpop.f32.mrb[23].mxu1  ;;  %v1449_v3 = vadd.f32 %v2362_v28, %v1353_v59  ;;  %v3316_v62 = vadd.f32 %v1446_v1, %v3196_v4 }
 0x6e4   : > { %v3313_v60 = vadd.f32 %v1438_v5, %v3193_v2  ;;  %v1441_v9 = vadd.f32 %v1440_v7, %v1345_v20 }
 0x6e5   : > { %v1466_v10 = vadd.f32 %v1465_v58, %v1464_v6  ;;  %v3324_v18 = vadd.f32 %v1449_v3, %v3204_v26  ;;  %v1471_v17 = vsel %vm343_vm0, %v3316_v62, 0.0 }
 0x6e6   : > { %v1467_v11 = vsel %vm343_vm0, %v3313_v60, 0.0  ;;  %v3321_v13 = vadd.f32 %v1441_v9, %v3201_v21 }
 0x6e7   : > { %v1468_v15 = vadd.f32 %v1467_v11, %v1466_v10  ;;  %v1473_v4 = vsel %vm343_vm0, %v3324_v18, 0.0 }
 0x6e8   : > { %v1469_v2 = vsel %vm343_vm0, %v3321_v13, 0.0 }
 0x6e9   : > { %v1470_v22 = vadd.f32 %v1469_v2, %v1468_v15 }
 0x6eb   : > { %v1472_v30 = vadd.f32 %v1471_v17, %v1470_v22 }
 0x6ed   : > { %v1474_v8 = vadd.f32 %v1473_v4, %v1472_v30 }
 0x6ef   : > { %v1475_v34 = vrot.slane %v1474_v8, 4 }
 0x6f1   : > { %v1476_v23 = vadd.f32 %v1475_v34, %v1474_v8 }
 0x6f3   : > { %v1477_v21 = vrot.slane %v1476_v23, 2 }
 0x6f5   : > { %v1478_v35 = vadd.f32 %v1477_v21, %v1476_v23 }
 0x6f7   : > { %v1479_v36 = vrot.slane %v1478_v35, 1 }
 0x6f9   : > { %v1480_v14 = vadd.f32 %v1479_v36, %v1478_v35 }
 0x6fb   : > { %v1481_v26 = vmul.f32 0.015625, %v1480_v14 }
 0x6fd   : > { %v1482_v29 = vsub.f32 %v3293_v19, %v1481_v26  ;;  %v1483_v37 = vsub.f32 %v3299_v56, %v1481_v26  ;;  %v1484_v38 = vsub.f32 %v3296_v45, %v1481_v26  ;;  %v1485_v39 = vsub.f32 %v3304_v57, %v1481_v26 }
 0x6fe   : > { %v1486_v33 = vsub.f32 %v3313_v60, %v1481_v26  ;;  %v1487_v49 = vsub.f32 %v3321_v13, %v1481_v26  ;;  %v1488_v41 = vsub.f32 %v3316_v62, %v1481_v26  ;;  %v1489_v61 = vsub.f32 %v3324_v18, %v1481_v26 }
 0x6ff   : > { %v1490_v12 = vmul.f32 %v1482_v29, %v1482_v29  ;;  %v1491_v46 = vmul.f32 %v1483_v37, %v1483_v37  ;;  %v1492_v54 = vmul.f32 %v1484_v38, %v1484_v38  ;;  %v1493_v51 = vmul.f32 %v1485_v39, %v1485_v39 }
 0x700   : > { %v1494_v20 = vmul.f32 %v1486_v33, %v1486_v33  ;;  %v1495_v27 = vmul.f32 %v1487_v49, %v1487_v49  ;;  %v1496_v31 = vmul.f32 %v1488_v41, %v1488_v41  ;;  %v1497_v59 = vmul.f32 %v1489_v61, %v1489_v61 }
 0x701   : > { %v1498_v52 = vsel %vm343_vm0, %v1490_v12, 0.0  ;;  %v1499_v40 = vsel %vm343_vm0, %v1491_v46, 0.0  ;;  %v1501_v25 = vsel %vm343_vm0, %v1492_v54, 0.0  ;;  %v1503_v55 = vsel %vm343_vm0, %v1493_v51, 0.0 }
 0x702   : > { %v1500_v24 = vadd.f32 %v1499_v40, %v1498_v52  ;;  %v1505_v1 = vsel %vm343_vm0, %v1494_v20, 0.0  ;;  %v1507_v28 = vsel %vm343_vm0, %v1495_v27, 0.0  ;;  %v1509_v7 = vsel %vm343_vm0, %v1496_v31, 0.0  ;;  %v2531_v40 = vld [vmem:[#allocation5 + $0x68] sm:$0xff]  }
 0x703   : > { %v1511_v3 = vsel %vm343_vm0, %v1497_v59, 0.0 }
 0x704   : > { %v1502_v32 = vadd.f32 %v1501_v25, %v1500_v24  ;;  %v1549_v24 = vpop.permute.xlu0 %1548 }
 0x706   : > { %v1504_v63 = vadd.f32 %v1503_v55, %v1502_v32 }
 0x708   : > { %v1506_v5 = vadd.f32 %v1505_v1, %v1504_v63 }
 0x70a   : > { %v1508_v6 = vadd.f32 %v1507_v28, %v1506_v5 }
 0x70c   : > { %v1510_v58 = vadd.f32 %v1509_v7, %v1508_v6 }
 0x70e   : > { %v1512_v9 = vadd.f32 %v1511_v3, %v1510_v58 }
 0x710   : > { %v1513_v10 = vrot.slane %v1512_v9, 4 }
 0x712   : > { %v1514_v11 = vadd.f32 %v1513_v10, %v1512_v9 }
 0x714   : > { %v1515_v15 = vrot.slane %v1514_v11, 2 }
 0x716   : > { %v1516_v2 = vadd.f32 %v1515_v15, %v1514_v11 }
 0x718   : > { %v1517_v22 = vrot.slane %v1516_v2, 1 }
 0x71a   : > { %v1518_v17 = vadd.f32 %v1517_v22, %v1516_v2 }
 0x71c   : > { %v1519_v30 = vmul.f32 0.015625, %v1518_v17 }
 0x71e   : > { %v1520_v4 = vadd.f32 1e-05, %v1519_v30 }
 0x720   : > { %2557 = vrsqrt.f32 %v1520_v4  ;;  %v2535_v4 = vld [vmem:[#allocation7 + $0x68] sm:$0xff]  }
 0x72a   : > { %v2558_v8 = vpop.eup %2557 }
 0x72b   : > { %v1522_v34 = vmul.f32 %v2558_v8, %v1482_v29  ;;  %v1523_v23 = vmul.f32 %v2558_v8, %v1483_v37  ;;  %v1524_v21 = vmul.f32 %v2558_v8, %v1484_v38  ;;  %v1525_v35 = vmul.f32 %v2558_v8, %v1485_v39  ;;  %v2532_v29 = vld [vmem:[#allocation5 + $0x70] sm:$0xff]   ;;  %v2533_v37 = vld [vmem:[#allocation5 + $0x78] sm:$0xff]   ;;  %v2534_v38 = vld [vmem:[#allocation7 + $0x60] sm:$0xff]  }
 0x72c   : > { %v1526_v26 = vmul.f32 %v2558_v8, %v1486_v33  ;;  %v1527_v12 = vmul.f32 %v2558_v8, %v1487_v49  ;;  %v1528_v54 = vmul.f32 %v2558_v8, %v1488_v41  ;;  %v1529_v51 = vmul.f32 %v2558_v8, %v1489_v61  ;;  %2387 = vmatprep.mubr.msk.bf16.mxu1 %vm343_vm0, %v2534_v38  ;;  %v1545_v33 = vpop.permute.xlu1 %1544  ;;  %v2536_v8 = vld [vmem:[#allocation7 + $0x70] sm:$0xff]  }
 0x72d   : > { %v1539_v36 = vpack.c.bf16 %v1523_v23, %v1522_v34  ;;  %v1540_v14 = vpack.c.bf16 %v1525_v35, %v1524_v21  ;;  %v2741_v39 = vmov 7   ;;  %v2537_v34 = vld [vmem:[#allocation7 + $0x78] sm:$0xff]   ;;  %v2742_v23 = vmov 0.0   ;;  %v2538_v21 = vld [vmem:[%s3458_s5] ss:$8 sps:$4 sm:$0xff]  }
 0x72e   : > { %v1541_v46 = vpack.c.bf16 %v1527_v12, %v1526_v26  ;;  %v1542_v52 = vpack.c.bf16 %v1529_v51, %v1528_v54  ;;  %2505 = vset.pattern.permute.xlu1 %v2741_v39  ;;  %2504 = vset.pattern.permute.xlu0 %v2741_v39  ;;  %v2540_v35 = vld [vmem:[%s3458_s5 + $0x4] ss:$8 sps:$4 sm:$0xff]   ;;  %v2544_v26 = vld [vmem:[%s3458_s5 + $0x20] ss:$8 sps:$4 sm:$0xff]   ;;  %v2549_v12 = vld [vmem:[%s3458_s5 + $0x34] ss:$8 sps:$4 sm:$0xff]  }
 0x72f   : > { %2363 = vmatprep.subr.bf16.mxu0 %v1539_v36  ;;  %1698 = vperm.xlu1 %2505, %v3235_v47  }
 0x730   : > { %2364 = vmatpush3.bf16.msra.mxu0 %v1539_v36  ;;  %1694 = vperm.xlu0 %2504, %v3241_v48   ;;  %v1553_v49 = vpop.permute.xlu1 %1552  ;;  %v1561_v48 = vpop.permute.xlu0 %1560  ;;  %v2543_v36 = vld [vmem:[%s3458_s5 + $0x14] ss:$8 sps:$4 sm:$0xff]  }
 0x731   : > { %2365 = vmatprep.subr.bf16.mxu0 %v1540_v14 }
 0x733   : > { %1702 = vperm.xlu1 %2505, %v3247_v16  }
 0x734   : > { %2366 = vmatpush3.bf16.msra.mxu0 %v1540_v14  ;;  %1706 = vperm.xlu0 %2504, %v3253_v42   ;;  %v1557_v41 = vpop.permute.xlu1 %1556  ;;  %v2546_v14 = vld [vmem:[%s3458_s5 + $0x24] ss:$8 sps:$4 sm:$0xff]  }
 0x735   : > { %2367 = vmatprep.subr.bf16.mxu0 %v1541_v46 }
 0x737   : > { %1710 = vperm.xlu1 %2505, %v3259_v43  }
 0x738   : > { %2368 = vmatpush3.bf16.msra.mxu0 %v1541_v46  ;;  %1714 = vperm.xlu0 %2504, %v3265_v44   ;;  %v1565_v61 = vpop.permute.xlu1 %1564  ;;  %v2547_v46 = vld [vmem:[%s3458_s5 + $0x30] ss:$8 sps:$4 sm:$0xff]  }
 0x739   : > { %2369 = vmatprep.subr.bf16.mxu0 %v1542_v52 }
 0x73b   : > { %1718 = vperm.xlu1 %2505, %v3271_v50  }
 0x73c   : > { %2370 = vmatpush3.bf16.msra.mxu0 %v1542_v52  ;;  %1722 = vperm.xlu0 %2504, %v3277_v53   ;;  %v1569_v53 = vpop.permute.xlu0 %1568  ;;  %v1573_v6 = vpop.permute.xlu1 %1572 }
 0x73d   : > { %2395 = vmatprep.subr.bf16.mxu0 %v2742_v23 }
 0x73f   : > { %2372 = vmatmul.mubr.msk.bf16.vlgmr.msra.gmra.mrb[24].mxu0 %vm343_vm0, %v2531_v40 }
 0x740   : > { %2375 = vmatprep.mubr.msk.bf16.mxu0 %vm343_vm0, %v2532_v29 }
 0x747   : > { %2376 = vmatmul.mubr.msk.bf16.gmra.mrb[28].mxu0 %vm343_vm0, %v2533_v37 }
 0x748   : > { %2403 = vmatprep.mubr.msk.bf16.mxu0 %vm2743_vm1, %v2742_v23 }
 0x7ae   : > { %v1699_v54 = vpop.permute.xlu1 %1698 }
 0x7af   : > { %v1695_v51 = vpop.permute.xlu0 %1694 }
 0x7b2   : > { %v1703_v52 = vpop.permute.xlu1 %1702 }
 0x7b3   : > { %v1707_v40 = vpop.permute.xlu0 %1706 }
 0x7b6   : > { %v1711_v39 = vpop.permute.xlu1 %1710 }
 0x812   : > { %v2373_v20 = vpop.f32.mrb[24].mxu0 }
 0x813   : > { %v1650_v47 = vadd.f32 %v2373_v20, %v1553_v49  ;;  %v1641_v25 = vpop.f32.mrb[25].mxu0  ;;  %v1715_v20 = vpop.permute.xlu0 %1714 }
 0x814   : > { %v1642_v32 = vadd.f32 %v1641_v25, %v1545_v33  ;;  %v2374_v16 = vpop.f32.mrb[26].mxu0 }
 0x815   : > { %v1653_v27 = vadd.f32 %v2374_v16, %v1557_v41  ;;  %v1644_v42 = vpop.f32.mrb[27].mxu0  ;;  %v1674_v55 = vmax.f32 %v1650_v47, 0.0 }
 0x816   : > { %v1645_v43 = vadd.f32 %v1644_v42, %v1549_v24  ;;  %v1672_v63 = vmax.f32 %v1642_v32, 0.0  ;;  %v1719_v42 = vpop.permute.xlu1 %1718 }
 0x817   : > { %v1675_v44 = vmax.f32 %v1653_v27, 0.0 }
 0x818   : > { %v1673_v50 = vmax.f32 %v1645_v43, 0.0 }
 0x819   : > { %v1690_v31 = vpack.c.bf16 %v1675_v44, %v1674_v55 }
 0x81a   : > { %v1689_v1 = vpack.c.bf16 %v1673_v50, %v1672_v63  ;;  %v2377_v5 = vpop.f32.mrb[28].mxu0  ;;  %v1723_v63 = vpop.permute.xlu0 %1722 }
 0x81b   : > { %v1666_v28 = vadd.f32 %v2377_v5, %v1569_v53  ;;  %v1657_v59 = vpop.f32.mrb[29].mxu0 }
 0x81c   : > { %v1658_v7 = vadd.f32 %v1657_v59, %v1561_v48  ;;  %v2378_v58 = vpop.f32.mrb[30].mxu0  ;;  %2379 = vmatprep.subr.bf16.mxu1 %v1689_v1 }
 0x81d   : > { %v1669_v3 = vadd.f32 %v2378_v58, %v1573_v6  ;;  %v1660_v9 = vpop.f32.mrb[31].mxu0  ;;  %2380 = vmatpush3.bf16.msra.mxu1 %v1689_v1  ;;  %v1678_v11 = vmax.f32 %v1666_v28, 0.0  ;;  %v1830_v6 = vld [vmem:[%s3457_s4] sm:$0x3] }
 0x81e   : > { %v1661_v10 = vadd.f32 %v1660_v9, %v1565_v61  ;;  %2381 = vmatprep.subr.bf16.mxu1 %v1690_v31  ;;  %v1676_v2 = vmax.f32 %v1658_v7, 0.0 }
 0x81f   : > { %v1679_v15 = vmax.f32 %v1669_v3, 0.0 }
 0x820   : > { %v1677_v22 = vmax.f32 %v1661_v10, 0.0 }
 0x821   : > { %v1692_v17 = vpack.c.bf16 %v1679_v15, %v1678_v11  ;;  %2382 = vmatpush3.bf16.msra.mxu1 %v1690_v31 }
 0x822   : > { %v1691_v30 = vpack.c.bf16 %v1677_v22, %v1676_v2 }
 0x824   : > { %2383 = vmatprep.subr.bf16.mxu1 %v1691_v30 }
 0x825   : > { %2384 = vmatpush3.bf16.msra.mxu1 %v1691_v30 }
 0x826   : > { %2385 = vmatprep.subr.bf16.mxu1 %v1692_v17 }
 0x829   : > { %2386 = vmatpush3.bf16.msra.mxu1 %v1692_v17 }
 0x82a   : > { %1934 = vmatprep.subr.bf16.mxu1 %v2540_v35 }
 0x82c   : > { %2388 = vmatmul.mubr.msk.bf16.vlgmr.msra.gmra.mrb[24].mxu1 %vm343_vm0, %v2535_v4 }
 0x82d   : > { %2391 = vmatprep.mubr.msk.bf16.mxu1 %vm343_vm0, %v2536_v8  ;;  %1935 = vmatpush1.bf16.msra.mxu1 %v2538_v21 }
 0x82e   : > { %1936 = vmatprep.subr.bf16.mxu1 %v2543_v36 }
 0x834   : > { %2392 = vmatmul.mubr.msk.bf16.gmra.mrb[28].mxu1 %vm343_vm0, %v2537_v34 }
 0x835   : > { %1966 = vmatprep.mubr.bf16.mxu1 %v2734_v0  ;;  %v2541_v0 = vld [vmem:[%s3458_s5 + $0x10] ss:$8 sps:$4 sm:$0xff]  }
 0x836   : > { %1937 = vmatpush1.bf16.msra.mxu1 %v2541_v0 }
 0x837   : > { %1938 = vmatprep.subr.bf16.mxu1 %v2546_v14 }
 0x83a   : > { %1939 = vmatpush1.bf16.msra.mxu1 %v2544_v26 }
 0x83b   : > { %1940 = vmatprep.subr.bf16.mxu1 %v2549_v12 }
 0x83e   : > { %1941 = vmatpush1.bf16.msra.mxu1 %v2547_v46 }
 0x8ff   : > { %v2389_v29 = vpop.f32.mrb[24].mxu1 }
 0x900   : > { %v1800_v37 = vadd.f32 %v2389_v29, %v1703_v52  ;;  %v1791_v38 = vpop.f32.mrb[25].mxu1 }
 0x901   : > { %v1792_v33 = vadd.f32 %v1791_v38, %v1695_v51  ;;  %v2390_v49 = vpop.f32.mrb[26].mxu1 }
 0x902   : > { %v1803_v24 = vadd.f32 %v2390_v49, %v1707_v40  ;;  %v1794_v41 = vpop.f32.mrb[27].mxu1  ;;  %v1824_v25 = vadd.f32 %v1800_v37, %v3296_v45 }
 0x903   : > { %v1795_v47 = vadd.f32 %v1794_v41, %v1699_v54  ;;  %v1822_v32 = vadd.f32 %v1792_v33, %v3293_v19 }
 0x904   : > { %v1825_v48 = vadd.f32 %v1803_v24, %v3304_v57 }
 0x905   : > { %v1823_v16 = vadd.f32 %v1795_v47, %v3299_v56 }
 0x906   : > { %v1832_v27 = vpack.c.bf16 %v1825_v48, %v1824_v25 }
 0x907   : > { %v1831_v61 = vpack.c.bf16 %v1823_v16, %v1822_v32  ;;  %v2393_v43 = vpop.f32.mrb[28].mxu1 }
 0x908   : > { %v1816_v55 = vadd.f32 %v2393_v43, %v1719_v42  ;;  %v1807_v44 = vpop.f32.mrb[29].mxu1 }
 0x909   : > { %v1808_v50 = vadd.f32 %v1807_v44, %v1711_v39  ;;  %v2394_v31 = vpop.f32.mrb[30].mxu1  ;;  %2396 = vmatpush3.bf16.msra.mxu0 %v1831_v61 }
 0x90a   : > { %v1819_v53 = vadd.f32 %v2394_v31, %v1723_v63  ;;  %v1810_v1 = vpop.f32.mrb[31].mxu1  ;;  %2397 = vmatprep.subr.bf16.mxu0 %v2742_v23  ;;  %v1828_v57 = vadd.f32 %v1816_v55, %v3316_v62 }
 0x90b   : > { %v1811_v45 = vadd.f32 %v1810_v1, %v1715_v20  ;;  %v1826_v56 = vadd.f32 %v1808_v50, %v3313_v60 }
 0x90c   : > { %v1829_v19 = vadd.f32 %v1819_v53, %v3324_v18 }
 0x90d   : > { %v1827_v5 = vadd.f32 %v1811_v45, %v3321_v13  ;;  %2398 = vmatpush3.bf16.msra.mxu0 %v1832_v27  ;;  %v1887_v13 = vld [vmem:[%s3459_s6] sm:$0xff] }
 0x90e   : > { %v1834_v28 = vpack.c.bf16 %v1829_v19, %v1828_v57  ;;  %2399 = vmatprep.subr.bf16.mxu0 %v2742_v23  ;;  %v1929_v3 = vcombine.high %v1887_v13, %v1887_v13 }
 0x90f   : > { %v1833_v59 = vpack.c.bf16 %v1827_v5, %v1826_v56 }
 0x911   : > { %2400 = vmatpush3.bf16.msra.mxu0 %v1833_v59 }
 0x912   : > { %2401 = vmatprep.subr.bf16.mxu0 %v2742_v23 }
 0x915   : > { %2402 = vmatpush3.bf16.msra.mxu0 %v1834_v28 }
 0x918   : > { %2404 = vmatmul.mubr.msk.bf16.vlgmr.msra.gmra.mrb[32].mxu0 %vm343_vm0, %v1830_v6 }
 0x9eb   : > { %v1872_v62 = vpop.f32.mrb[32].mxu0 }
 0x9ec   : > { %v1878_v7 = vpack.c.bf16 %v1872_v62, %v1872_v62  ;;  %v2405_v18 = vpop.f32.mrb[33].mxu0 }
 0x9ed   : > { %v1875_v58 = vpop.f32.mrb[34].mxu0 }
 0x9ee   : > { %v2406_v60 = vpop.f32.mrb[35].mxu0  ;;  %2190 = vmatmul.mubr.msk.bf16.vlgmr.msra.gmra.mrb[32].mxu1 %vm343_vm0, %v1878_v7 }
 0xac1   : > { %v1968_v9 = vpop.f32.mrb[32].mxu1 }
 0xac2   : > { %v1969_v10 = vadd.f32 %v1968_v9, %v1887_v13  ;;  %v1970_v11 = vpop.f32.mrb[33].mxu1 }
 0xac3   : > { %v1971_v15 = vadd.f32 %v1970_v11, %v1929_v3  ;;  %v1972_v2 = vpop.f32.mrb[34].mxu1 }
 0xac4   : > { %v1975_v22 = vmul.f32 %v1969_v10, %v1969_v10  ;;  %v1973_v17 = vpop.f32.mrb[35].mxu1 }
 0xac5   : > { %v1976_v30 = vmul.f32 %v1971_v15, %v1971_v15 }
 0xac6   : > { %v1978_v4 = vsel %vm1977_vm2, %v1975_v22, 0.0 }
 0xac7   : > { %v1979_v8 = vsel %vm1977_vm2, %v1976_v30, 0.0 }
 0xac8   : > { %v1980_v34 = vadd.f32 %v1979_v8, %v1978_v4 }
 0xaca   : > { %1981 = vadd.xlane.f32.xlu1 %v1980_v34 }
 0xb57   : > { %v1982_v23 = vpop.xlane.xlu1 %1981 }
 0xb58   : > { %v1983_v21 = vrot.slane %v1982_v23, 4 }
 0xb5a   : > { %v1984_v35 = vadd.f32 %v1983_v21, %v1982_v23 }
 0xb5c   : > { %v1985_v36 = vrot.slane %v1984_v35, 2 }
 0xb5e   : > { %v1986_v0 = vadd.f32 %v1985_v36, %v1984_v35 }
 0xb60   : > { %v1987_v14 = vrot.slane %v1986_v0, 1 }
 0xb62   : > { %v1988_v26 = vadd.f32 %v1987_v14, %v1986_v0 }
 0xb64   : > { %2407 = vpush %v1988_v26 }
 0xb95   : > { %s2408_s30 = spop %2407 }
 0xb96   : > { %v1990_v12 = vstv %s2408_s30 }
 0xb97   : > { %v1991_v46 = vmax.f32 %v1990_v12, 1e-24 }
 0xb99   : > { %2559 = vrsqrt.f32 %v1991_v46 }
 0xba3   : > { %v2560_v54 = vpop.eup %2559 }
 0xba4   : > { %v1993_v51 = vmul.f32 %v2560_v54, %v1969_v10  ;;  %v1994_v52 = vmul.f32 %v2560_v54, %v1971_v15 }
 0xba6   : > { %v1997_v40 = vcombine.low %v1993_v51, %v1994_v52 }
 0xba8   : > { %1999 = vst [vmem:[%s325_s11] sm:$0xff] %v1997_v40 }
 0xba9   : > { %2668 = shalt.err (!%p2665_p2)
}
 0xbaa   : > { %s2669_s23 = scalar_lea.hbm %s3409_s19, 128  ;;  %s2673_s9 = scalar_lea.hbm %s3460_s7, 256 }
 0xbab   : > { %p2670_p13 = scmp.ne.s32.totalorder %s3409_s19, %s2669_s23  ;;  %p2674_p4 = scmp.lt.u32.totalorder %s3409_s19, %s3460_s7 }
 0xbac   : > { %p2675_p5 = scmp.lt.u32.totalorder %s2673_s9, %s2669_s23  ;;  %p2677_p8 = scmp.lt.u32.totalorder %s2669_s23, %s3409_s19 }
 0xbad   : > { %p2671_p6 = pnand %p2670_p13, %p3474_p0 }
 0xbae   : > { %p2676_p11 = por %p2675_p5, %p2674_p4 }
 0xbaf   : > { %p2672_p10 = pneg %p2671_p6 }
 0xbb0   : > { %p2678_p1 = por %p2677_p8, %p2676_p11 }
 0xbb2   : > { %p2679_p3 = pnand %p2678_p1, %p2672_p10 }
 0xbb4   : > { %2682 = shalt.err (!%p2679_p3)
}
 0xbb5   : > { %2419 = dma.vmem_to_hbm [thread:$0]  (%p3474_p0), %s3411_s22, 128, %s3409_s19, %s2001_s12  }
 0xbb6 PF: > { %s2027_s10 = sand.u32 1, %s2713_s24   ;;  %p3475_p7 = scmp.ne.s32.totalorder %s3465_s8, 0 }
 0xbb7   : > { %p3476_p9 = scmp.ge.s32.totalorder %s2725_s27, 2  ;;  %s2028_s15 = scalar_lea.sflag [#allocation4], %s2027_s10 }
 0xbb9   : > { %p2433_p12 = pnand %p3476_p9, %p3475_p7 }
 0xbbb   : > { %2708 = dma.done.wait (!%p2433_p12), %s2028_s15, 128  }
 0xbbc   : > { %2710 = vsyncadd (!%p2433_p12), %s2028_s15, 4294967168  ;;  %p21_p2 = scmp.ge.s32.totalorder %s2895_s13, 4   ;;  %s3477_s24 = smov %s2717_s25 }
 0xbbd   : > { %s3478_s25 = smov %s2721_s26  ;;  %s3479_s26 = smov %s2911_s17 }
 0xbbe   : > { %s3480_s27 = smov %s2895_s13  ;;  %23 = sbr.rel (!%p21_p2) target bundleno = 6 (0x6), region = 107 }
 0xbc5   :  { %2033 = vsyncpa [#allocation3], 1 }
 0xbc6   :  { %2035 = vsyncpa [#allocation3 + $0x1], 1 }
 0xbc7   :  { %2036 = vsyncpa [#allocation6], 1 }
 0xbc8   :  { %2037 = vsyncpa [#allocation4], 1 }
 0xbc9   :  { %2039 = vsyncpa [#allocation4 + $0x1], 1 }

</bundles_post_ra>
